<compile_context>
chip_gen: v5e
topology: v5e:2x2
jax: 0.10.0
libtpu: 0.0.40
codegen_flags: <defaults>
</compile_context>

<pallas_src>
import jax
import jax.numpy as jnp
from jax.experimental import pallas as pl
from jax.experimental.pallas import tpu as pltpu

BN_EPS = 1e-5


def _softsign(z):
    return z / (1.0 + jnp.abs(z))


def _pick_s_block(S):
    """Largest lane-dense tile of the flattened spatial axis."""
    for cand in (2048, 1024, 512, 256, 128):
        if S % cand == 0:
            return cand
    return S


# --------------------------------------------------------------------------
# Kernel 1: per-batch pooled means of x, packed as one vector [T | Nx | Ny].
# Grid over B ("parallel"); only tiny [1, D] outputs.
# --------------------------------------------------------------------------
def _pool_kernel(x_ref, q_ref, p_ref, pooled_ref):
    # x_ref: (1, T, S); q_ref: (S, Nx); p_ref: (S, Ny); pooled_ref: (1, 1, D)
    X = x_ref[...].astype(jnp.float32)                      # [1, T, S]
    T = X.shape[1]
    Nx = q_ref.shape[1]
    Ny = p_ref.shape[1]

    pa = jnp.mean(X, axis=2)                                # [1, T]
    xs = jnp.sum(X, axis=1)                                 # [1, S]
    pb = jnp.dot(xs, q_ref[...],
                 preferred_element_type=jnp.float32) * (1.0 / (T * Ny))   # [1, Nx]
    pc = jnp.dot(xs, p_ref[...],
                 preferred_element_type=jnp.float32) * (1.0 / (T * Nx))   # [1, Ny]

    pooled_ref[0] = jnp.concatenate([pa, pb, pc], axis=1)   # [1, D]


# --------------------------------------------------------------------------
# Kernel 2: serial R-rank residual chain, entirely in closed form on the
# pooled statistics (the residual tensor x_cp is never materialized).
# Gridless; operates only on tiny [B, D]-sized data.
# --------------------------------------------------------------------------
def _rank_chain_kernel(pooled_ref, wbd_ref, bcat_ref, qt_ref, pt_ref, w_ref,
                       scale_ref, spat_ref):
    # pooled_ref: (B, 1, D)  with D = T + Nx + Ny
    # wbd_ref:    (R, D, D)  block-diag( Wa^T, Wb^T, Wc^T ) per rank (pre-transposed)
    # bcat_ref:   (R, 1, D)  concatenated biases
    # qt_ref:     (Nx, S), pt_ref: (Ny, S)  expansion matrices (pre-transposed)
    # w_ref:      (R,) softmax(tensor_weight), SMEM
    # scale_ref:  (B, R+1, T) out; spat_ref: (B, R+1, S) out
    Bsz = pooled_ref.shape[0]
    D = pooled_ref.shape[2]
    R = wbd_ref.shape[0]
    Nx, S = qt_ref.shape
    Ny = pt_ref.shape[0]
    T = D - Nx - Ny

    pooled = pooled_ref[:, 0, :]                            # [B, D]
    off = jnp.zeros((1, T), jnp.float32)                    # sum_r w_r*inv_r*mu_r

    for r in range(R):                                      # static unroll over ranks
        # Fused block-diagonal branch matmul: one MXU trip instead of three.
        z = jnp.dot(pooled, wbd_ref[r],
                    preferred_element_type=jnp.float32) + bcat_ref[r]      # [B, D]
        v = _softsign(z)
        av = v[:, 0:T]                                      # [B, T]
        bv = v[:, T:T + Nx]                                 # [B, Nx]
        cv = v[:, T + Nx:D]                                 # [B, Ny]

        # Analytic BatchNorm statistics of the rank-1 tensor a⊗b⊗c.
        bbar = jnp.mean(bv, axis=1, keepdims=True)          # [B, 1]
        cbar = jnp.mean(cv, axis=1, keepdims=True)          # [B, 1]
        b2 = jnp.mean(bv * bv, axis=1, keepdims=True)       # [B, 1]
        c2 = jnp.mean(cv * cv, axis=1, keepdims=True)       # [B, 1]
        mu = jnp.mean(av * (bbar * cbar), axis=0, keepdims=True)      # [1, T]
        m2 = jnp.mean((av * av) * (b2 * c2), axis=0, keepdims=True)   # [1, T]
        var = jnp.maximum(m2 - mu * mu, 0.0)                # clamp one-pass variance
        inv = jax.lax.rsqrt(var + BN_EPS)                   # [1, T]

        wr = w_ref[r]                                       # SMEM scalar

        scale_ref[:, r, :] = (wr * inv) * av                # [B, T]
        spat_ref[:, r, :] = (
            jnp.dot(bv, qt_ref[...], preferred_element_type=jnp.float32) *
            jnp.dot(cv, pt_ref[...], preferred_element_type=jnp.float32))   # [B, S]
        off = off + wr * (inv * mu)

        if r + 1 < R:
            # Closed-form pooled means of the residual (x_cp never built).
            pa_n = pooled[:, 0:T] - inv * (av * (bbar * cbar) - mu)         # [B, T]
            a1 = jnp.mean(inv * av, axis=1, keepdims=True)                  # [B, 1]
            m1 = jnp.mean(inv * mu, axis=1, keepdims=True)                  # [1, 1]
            pb_n = pooled[:, T:T + Nx] - (bv * (cbar * a1) - m1)            # [B, Nx]
            pc_n = pooled[:, T + Nx:D] - (cv * (bbar * a1) - m1)            # [B, Ny]
            pooled = jnp.concatenate([pa_n, pb_n, pc_n], axis=1)            # [B, D]

    # Pseudo-rank folding the "-mu" BN correction into the contraction.
    scale_ref[:, R, :] = jnp.broadcast_to(-off, (Bsz, T))
    spat_ref[:, R, :] = jnp.ones((Bsz, S), jnp.float32)


# --------------------------------------------------------------------------
# Kernel 3: the ONLY full-tensor pass.  out = x + scale @ spat
# Grid over (B, S-tiles), both "parallel"; one MXU contraction over R+1 ranks
# plus one fused add/store per tile.
# --------------------------------------------------------------------------
def _apply_kernel(x_ref, scale_ref, spat_ref, out_ref):
    # x_ref: (1, T, S_blk); scale_ref: (1, T, R+1); spat_ref: (1, R+1, S_blk)
    delta = jnp.dot(scale_ref[0], spat_ref[0],
                    preferred_element_type=jnp.float32)     # [T, S_blk]
    out_ref[0] = (x_ref[0].astype(jnp.float32) + delta).astype(out_ref.dtype)


@jax.jit
def cp_lowrank_forward(x, Wa, ba, Wb, bb, Wc, bc, w):
    B, T, Nx, Ny = x.shape
    S = Nx * Ny
    R = Wa.shape[0]
    R1 = R + 1
    D = T + Nx + Ny

    # Lane-dense view: spatial dims flattened onto the 128-wide lane axis.
    x2 = x.reshape(B, T, S)

    # Indicator matrices for pooling / outer-product expansion on the
    # flattened spatial axis (tiny constants built once by XLA).
    s_idx = jnp.arange(S, dtype=jnp.int32)
    Q = (s_idx[:, None] // Ny == jnp.arange(Nx, dtype=jnp.int32)[None, :]
         ).astype(jnp.float32)                              # [S, Nx]
    P = (s_idx[:, None] % Ny == jnp.arange(Ny, dtype=jnp.int32)[None, :]
         ).astype(jnp.float32)                              # [S, Ny]
    Qt = Q.T                                                # [Nx, S]
    Pt = P.T                                                # [Ny, S]

    # Block-diagonal, pre-transposed branch weights + concatenated biases.
    Wbd = jnp.zeros((R, D, D), jnp.float32)
    Wbd = Wbd.at[:, 0:T, 0:T].set(jnp.swapaxes(Wa, 1, 2))
    Wbd = Wbd.at[:, T:T + Nx, T:T + Nx].set(jnp.swapaxes(Wb, 1, 2))
    Wbd = Wbd.at[:, T + Nx:, T + Nx:].set(jnp.swapaxes(Wc, 1, 2))
    bcat = jnp.concatenate([ba, bb, bc], axis=2)            # [R, 1, D]

    vmem = pl.BlockSpec(memory_space=pltpu.MemorySpace.VMEM)
    smem = pl.BlockSpec(memory_space=pltpu.MemorySpace.SMEM)

    # ---- Kernel 1: per-batch pooled means ------------------------------
    pooled = pl.pallas_call(
        _pool_kernel,
        out_shape=jax.ShapeDtypeStruct((B, 1, D), jnp.float32),
        grid=(B,),
        in_specs=[
            pl.BlockSpec((1, T, S), lambda b: (b, 0, 0)),
            pl.BlockSpec((S, Nx), lambda b: (0, 0)),
            pl.BlockSpec((S, Ny), lambda b: (0, 0)),
        ],
        out_specs=pl.BlockSpec((1, 1, D), lambda b: (b, 0, 0)),
        compiler_params=pltpu.CompilerParams(
            dimension_semantics=("parallel",)),
    )(x2, Q, P)

    # ---- Kernel 2: serial rank chain on tiny pooled statistics ---------
    scale_rt, spat = pl.pallas_call(
        _rank_chain_kernel,
        out_shape=(jax.ShapeDtypeStruct((B, R1, T), jnp.float32),
                   jax.ShapeDtypeStruct((B, R1, S), jnp.float32)),
        in_specs=[vmem, vmem, vmem, vmem, vmem, smem],
        out_specs=(vmem, vmem),
    )(pooled, Wbd, bcat, Qt, Pt, w)

    # Tiny [B, R+1, T] -> [B, T, R+1] transpose so the heavy kernel gets a
    # standard (1, 0) MXU contraction (pre-transpose feedback item).
    scale = jnp.swapaxes(scale_rt, 1, 2)                    # [B, T, R1]

    # ---- Kernel 3: gridded heavy pass (single rank contraction) --------
    S_blk = _pick_s_block(S)
    out2 = pl.pallas_call(
        _apply_kernel,
        out_shape=jax.ShapeDtypeStruct((B, T, S), x.dtype),
        grid=(B, S // S_blk),
        in_specs=[
            pl.BlockSpec((1, T, S_blk), lambda b, s: (b, 0, s)),
            pl.BlockSpec((1, T, R1), lambda b, s: (b, 0, 0)),
            pl.BlockSpec((1, R1, S_blk), lambda b, s: (b, 0, s)),
        ],
        out_specs=pl.BlockSpec((1, T, S_blk), lambda b, s: (b, 0, s)),
        compiler_params=pltpu.CompilerParams(
            dimension_semantics=("parallel", "parallel")),
    )(x2, scale, spat)

    return out2.reshape(B, T, Nx, Ny)


def reference_forward(x, Wa, ba, Wb, bb, Wc, bc, w):
    """Pure-JAX reference mirroring the PyTorch forward (direct computation)."""
    R = Wa.shape[0]
    x = x.astype(jnp.float32)
    x_cp = x
    acc = x
    for r in range(R):
        pa = jnp.mean(x_cp, axis=(2, 3))
        pb = jnp.mean(x_cp, axis=(1, 3))
        pc = jnp.mean(x_cp, axis=(1, 2))
        av = _softsign(pa @ Wa[r].T + ba[r, 0])
        bv = _softsign(pb @ Wb[r].T + bb[r, 0])
        cv = _softsign(pc @ Wc[r].T + bc[r, 0])
        cp = av[:, :, None, None] * bv[:, None, :, None] * cv[:, None, None, :]
        mu = jnp.mean(cp, axis=(0, 2, 3), keepdims=True)
        var = jnp.mean((cp - mu) ** 2, axis=(0, 2, 3), keepdims=True)
        bn = (cp - mu) * jax.lax.rsqrt(var + BN_EPS)
        x_cp = x_cp - bn
        acc = acc + w[r] * bn
    return acc


if __name__ == "__main__":
    # Small shapes consistent with the module: x: [B, T, Nx, Ny], R ranks.
    B, T, Nx, Ny, R = 2, 4, 16, 16, 3

    key = jax.random.PRNGKey(0)
    kx, ka, kab, kb, kbb, kc, kcb = jax.random.split(key, 7)

    x = jax.random.normal(kx, (B, T, Nx, Ny), dtype=jnp.float32)

    # Deterministic parameter init (conv1x1 weights + biases per rank).
    Wa = 0.2 * jax.random.normal(ka, (R, T, T), dtype=jnp.float32)
    ba = 0.1 * jax.random.normal(kab, (R, 1, T), dtype=jnp.float32)
    Wb = 0.2 * jax.random.normal(kb, (R, Nx, Nx), dtype=jnp.float32)
    bb = 0.1 * jax.random.normal(kbb, (R, 1, Nx), dtype=jnp.float32)
    Wc = 0.2 * jax.random.normal(kc, (R, Ny, Ny), dtype=jnp.float32)
    bc = 0.1 * jax.random.normal(kcb, (R, 1, Ny), dtype=jnp.float32)

    # tensor_weight = ones(R); softmax over rank dim -> uniform weights.
    w = jax.nn.softmax(jnp.ones((R,), dtype=jnp.float32))

    out = cp_lowrank_forward(x, Wa, ba, Wb, bb, Wc, bc, w)
    out = jax.block_until_ready(out)

    ref = reference_forward(x, Wa, ba, Wb, bb, Wc, bc, w)
    assert out.shape == (B, T, Nx, Ny)
    assert jnp.allclose(out, ref, atol=1e-2, rtol=1e-2)

    print("KERNEL_OK")
</pallas_src>

<mosaic_0001>
module attributes {stable_mosaic.version = 11 : i64} {
  func.func @_pool_kernel(%arg0: i32, %arg1: memref<1x4x256xf32, #tpu.memory_space<vmem>>, %arg2: memref<256x16xf32, #tpu.memory_space<vmem>>, %arg3: memref<256x16xf32, #tpu.memory_space<vmem>>, %arg4: memref<1x1x36xf32, #tpu.memory_space<vmem>>) attributes {dimension_semantics = [#tpu.dimension_semantics<parallel>], iteration_bounds = array<i64: 2>, scalar_prefetch = 0 : i64, scratch_operands = 0 : i64, tpu.core_type = #tpu.core_type<tc>, window_params = [{transform_indices = @transform_0, window_bounds = array<i64: 1, 4, 256>}, {pipeline_mode = #tpu.pipeline_mode<synchronous>, transform_indices = @transform_1, window_bounds = array<i64: 256, 16>}, {pipeline_mode = #tpu.pipeline_mode<synchronous>, transform_indices = @transform_2, window_bounds = array<i64: 256, 16>}, {transform_indices = @transform_3, window_bounds = array<i64: 1, 1, 36>}]} {
    %c0 = arith.constant 0 : index
    %c0_0 = arith.constant 0 : index
    %c0_1 = arith.constant 0 : index
    %0 = vector.load %arg1[%c0, %c0_0, %c0_1] : memref<1x4x256xf32, #tpu.memory_space<vmem>>, vector<1x4x256xf32>
    %cst = arith.constant dense<0.000000e+00> : vector<1x4xf32>
    %1 = vector.multi_reduction <add>, %0, %cst [2] : vector<1x4x256xf32> to vector<1x4xf32>
    %cst_2 = arith.constant 2.560000e+02 : f32
    %2 = vector.broadcast %cst_2 : f32 to vector<1x4xf32>
    %3 = arith.divf %1, %2 : vector<1x4xf32>
    %cst_3 = arith.constant dense<0.000000e+00> : vector<1x256xf32>
    %4 = vector.multi_reduction <add>, %0, %cst_3 [1] : vector<1x4x256xf32> to vector<1x256xf32>
    %c0_4 = arith.constant 0 : index
    %c0_5 = arith.constant 0 : index
    %5 = vector.load %arg2[%c0_4, %c0_5] : memref<256x16xf32, #tpu.memory_space<vmem>>, vector<256x16xf32>
    %cst_6 = arith.constant dense<0.000000e+00> : vector<1x16xf32>
    %6 = tpu.matmul %4, %5, %cst_6 {dimension_numbers = #tpu.dot_dimension_numbers<[1], [0], [0], [1], [0, 0, 1, 1], [], []>} : vector<1x256xf32>, vector<256x16xf32>, vector<1x16xf32> -> vector<1x16xf32>
    %cst_7 = arith.constant 1.562500e-02 : f32
    %7 = vector.broadcast %cst_7 : f32 to vector<1x16xf32>
    %8 = arith.mulf %6, %7 : vector<1x16xf32>
    %c0_8 = arith.constant 0 : index
    %c0_9 = arith.constant 0 : index
    %9 = vector.load %arg3[%c0_8, %c0_9] : memref<256x16xf32, #tpu.memory_space<vmem>>, vector<256x16xf32>
    %cst_10 = arith.constant dense<0.000000e+00> : vector<1x16xf32>
    %10 = tpu.matmul %4, %9, %cst_10 {dimension_numbers = #tpu.dot_dimension_numbers<[1], [0], [0], [1], [0, 0, 1, 1], [], []>} : vector<1x256xf32>, vector<256x16xf32>, vector<1x16xf32> -> vector<1x16xf32>
    %cst_11 = arith.constant 1.562500e-02 : f32
    %11 = vector.broadcast %cst_11 : f32 to vector<1x16xf32>
    %12 = arith.mulf %10, %11 : vector<1x16xf32>
    %13 = tpu.concatenate %3, %8, %12 in 1 : vector<1x4xf32>, vector<1x16xf32>, vector<1x16xf32> -> vector<1x36xf32>
    %c0_12 = arith.constant 0 : index
    %c0_13 = arith.constant 0 : index
    %c0_14 = arith.constant 0 : index
    %14 = vector.load %arg4[%c0_12, %c0_13, %c0_14] : memref<1x1x36xf32, #tpu.memory_space<vmem>>, vector<1x1x36xf32>
    %15 = vector.shape_cast %14 : vector<1x1x36xf32> to vector<1x36xf32>
    %16 = vector.shape_cast %13 : vector<1x36xf32> to vector<1x1x36xf32>
    tpu.vector_store %arg4[%c0_12, %c0_13, %c0_14], %16 {strides = array<i32>} : memref<1x1x36xf32, #tpu.memory_space<vmem>>, vector<1x1x36xf32>,
    return
  }
  func.func @transform_0(%arg0: i32) -> (i32, i32, i32) {
    %c0_i32 = arith.constant 0 : i32
    %c0_i32_0 = arith.constant 0 : i32
    %c0_i32_1 = arith.constant 0 : i32
    return %arg0, %c0_i32, %c0_i32_0 : i32, i32, i32
  }
  func.func @transform_1(%arg0: i32) -> (i32, i32) {
    %c0_i32 = arith.constant 0 : i32
    %c0_i32_0 = arith.constant 0 : i32
    %c0_i32_1 = arith.constant 0 : i32
    return %c0_i32, %c0_i32_0 : i32, i32
  }
  func.func @transform_2(%arg0: i32) -> (i32, i32) {
    %c0_i32 = arith.constant 0 : i32
    %c0_i32_0 = arith.constant 0 : i32
    %c0_i32_1 = arith.constant 0 : i32
    return %c0_i32, %c0_i32_0 : i32, i32
  }
  func.func @transform_3(%arg0: i32) -> (i32, i32, i32) {
    %c0_i32 = arith.constant 0 : i32
    %c0_i32_0 = arith.constant 0 : i32
    %c0_i32_1 = arith.constant 0 : i32
    return %arg0, %c0_i32, %c0_i32_0 : i32, i32, i32
  }
}

module attributes {stable_mosaic.version = 11 : i64} {
  func.func @_rank_chain_kernel(%arg0: memref<2x1x36xf32, #tpu.memory_space<vmem>>, %arg1: memref<3x36x36xf32, #tpu.memory_space<vmem>>, %arg2: memref<3x1x36xf32, #tpu.memory_space<vmem>>, %arg3: memref<16x256xf32, #tpu.memory_space<vmem>>, %arg4: memref<16x256xf32, #tpu.memory_space<vmem>>, %arg5: memref<3xf32, #tpu.memory_space<smem>>, %arg6: memref<2x4x4xf32, #tpu.memory_space<vmem>>, %arg7: memref<2x4x256xf32, #tpu.memory_space<vmem>>) attributes {dimension_semantics = [], scalar_prefetch = 0 : i64, scratch_operands = 0 : i64, tpu.core_type = #tpu.core_type<tc>} {
    %c0 = arith.constant 0 : index
    %c0_0 = arith.constant 0 : index
    %c0_1 = arith.constant 0 : index
    %0 = vector.load %arg0[%c0, %c0_0, %c0_1] : memref<2x1x36xf32, #tpu.memory_space<vmem>>, vector<2x1x36xf32>
    %1 = vector.shape_cast %0 : vector<2x1x36xf32> to vector<2x36xf32>
    %cst = arith.constant 0.000000e+00 : f32
    %2 = vector.broadcast %cst : f32 to vector<1x4xf32>
    %c0_2 = arith.constant 0 : index
    %c0_3 = arith.constant 0 : index
    %c0_4 = arith.constant 0 : index
    %3 = vector.load %arg1[%c0_2, %c0_3, %c0_4] : memref<3x36x36xf32, #tpu.memory_space<vmem>>, vector<1x36x36xf32>
    %4 = vector.shape_cast %3 : vector<1x36x36xf32> to vector<36x36xf32>
    %cst_5 = arith.constant dense<0.000000e+00> : vector<2x36xf32>
    %5 = tpu.matmul %1, %4, %cst_5 {dimension_numbers = #tpu.dot_dimension_numbers<[1], [0], [0], [1], [0, 0, 1, 1], [], []>} : vector<2x36xf32>, vector<36x36xf32>, vector<2x36xf32> -> vector<2x36xf32>
    %c0_6 = arith.constant 0 : index
    %c0_7 = arith.constant 0 : index
    %c0_8 = arith.constant 0 : index
    %6 = vector.load %arg2[%c0_6, %c0_7, %c0_8] : memref<3x1x36xf32, #tpu.memory_space<vmem>>, vector<1x1x36xf32>
    %7 = vector.shape_cast %6 : vector<1x1x36xf32> to vector<1x36xf32>
    %8 = vector.broadcast %7 : vector<1x36xf32> to vector<2x36xf32>
    %9 = arith.addf %5, %8 : vector<2x36xf32>
    %10 = math.absf %9 : vector<2x36xf32>
    %cst_9 = arith.constant 1.000000e+00 : f32
    %11 = vector.broadcast %cst_9 : f32 to vector<2x36xf32>
    %12 = arith.addf %11, %10 : vector<2x36xf32>
    %13 = arith.divf %9, %12 : vector<2x36xf32>
    %14 = vector.extract_strided_slice %13 {offsets = [0, 0], sizes = [2, 4], strides = [1, 1]} : vector<2x36xf32> to vector<2x4xf32>
    %15 = vector.extract_strided_slice %13 {offsets = [0, 4], sizes = [2, 16], strides = [1, 1]} : vector<2x36xf32> to vector<2x16xf32>
    %16 = vector.extract_strided_slice %13 {offsets = [0, 20], sizes = [2, 16], strides = [1, 1]} : vector<2x36xf32> to vector<2x16xf32>
    %cst_10 = arith.constant dense<0.000000e+00> : vector<2xf32>
    %17 = vector.multi_reduction <add>, %15, %cst_10 [1] : vector<2x16xf32> to vector<2xf32>
    %18 = vector.shape_cast %17 : vector<2xf32> to vector<2x1xf32>
    %cst_11 = arith.constant 1.600000e+01 : f32
    %19 = vector.broadcast %cst_11 : f32 to vector<2x1xf32>
    %20 = arith.divf %18, %19 : vector<2x1xf32>
    %cst_12 = arith.constant dense<0.000000e+00> : vector<2xf32>
    %21 = vector.multi_reduction <add>, %16, %cst_12 [1] : vector<2x16xf32> to vector<2xf32>
    %22 = vector.shape_cast %21 : vector<2xf32> to vector<2x1xf32>
    %cst_13 = arith.constant 1.600000e+01 : f32
    %23 = vector.broadcast %cst_13 : f32 to vector<2x1xf32>
    %24 = arith.divf %22, %23 : vector<2x1xf32>
    %25 = arith.mulf %15, %15 : vector<2x16xf32>
    %cst_14 = arith.constant dense<0.000000e+00> : vector<2xf32>
    %26 = vector.multi_reduction <add>, %25, %cst_14 [1] : vector<2x16xf32> to vector<2xf32>
    %27 = vector.shape_cast %26 : vector<2xf32> to vector<2x1xf32>
    %cst_15 = arith.constant 1.600000e+01 : f32
    %28 = vector.broadcast %cst_15 : f32 to vector<2x1xf32>
    %29 = arith.divf %27, %28 : vector<2x1xf32>
    %30 = arith.mulf %16, %16 : vector<2x16xf32>
    %cst_16 = arith.constant dense<0.000000e+00> : vector<2xf32>
    %31 = vector.multi_reduction <add>, %30, %cst_16 [1] : vector<2x16xf32> to vector<2xf32>
    %32 = vector.shape_cast %31 : vector<2xf32> to vector<2x1xf32>
    %cst_17 = arith.constant 1.600000e+01 : f32
    %33 = vector.broadcast %cst_17 : f32 to vector<2x1xf32>
    %34 = arith.divf %32, %33 : vector<2x1xf32>
    %35 = arith.mulf %20, %24 : vector<2x1xf32>
    %36 = vector.broadcast %35 : vector<2x1xf32> to vector<2x4xf32>
    %37 = arith.mulf %14, %36 : vector<2x4xf32>
    %cst_18 = arith.constant dense<0.000000e+00> : vector<4xf32>
    %38 = vector.multi_reduction <add>, %37, %cst_18 [0] : vector<2x4xf32> to vector<4xf32>
    %39 = vector.shape_cast %38 : vector<4xf32> to vector<1x4xf32>
    %cst_19 = arith.constant 2.000000e+00 : f32
    %40 = vector.broadcast %cst_19 : f32 to vector<1x4xf32>
    %41 = arith.divf %39, %40 : vector<1x4xf32>
    %42 = arith.mulf %14, %14 : vector<2x4xf32>
    %43 = arith.mulf %29, %34 : vector<2x1xf32>
    %44 = vector.broadcast %43 : vector<2x1xf32> to vector<2x4xf32>
    %45 = arith.mulf %42, %44 : vector<2x4xf32>
    %cst_20 = arith.constant dense<0.000000e+00> : vector<4xf32>
    %46 = vector.multi_reduction <add>, %45, %cst_20 [0] : vector<2x4xf32> to vector<4xf32>
    %47 = vector.shape_cast %46 : vector<4xf32> to vector<1x4xf32>
    %cst_21 = arith.constant 2.000000e+00 : f32
    %48 = vector.broadcast %cst_21 : f32 to vector<1x4xf32>
    %49 = arith.divf %47, %48 : vector<1x4xf32>
    %50 = arith.mulf %41, %41 : vector<1x4xf32>
    %51 = arith.subf %49, %50 : vector<1x4xf32>
    %cst_22 = arith.constant 0.000000e+00 : f32
    %52 = vector.broadcast %cst_22 : f32 to vector<1x4xf32>
    %53 = arith.maximumf %51, %52 : vector<1x4xf32>
    %cst_23 = arith.constant 9.99999974E-6 : f32
    %54 = vector.broadcast %cst_23 : f32 to vector<1x4xf32>
    %55 = arith.addf %53, %54 : vector<1x4xf32>
    %56 = math.rsqrt %55 : vector<1x4xf32>
    %c0_24 = arith.constant 0 : index
    %57 = memref.load %arg5[%c0_24] : memref<3xf32, #tpu.memory_space<smem>>
    %58 = vector.broadcast %57 : f32 to vector<1x4xf32>
    %59 = arith.mulf %58, %56 : vector<1x4xf32>
    %60 = vector.broadcast %59 : vector<1x4xf32> to vector<2x4xf32>
    %61 = arith.mulf %60, %14 : vector<2x4xf32>
    %c0_25 = arith.constant 0 : index
    %c0_26 = arith.constant 0 : index
    %c0_27 = arith.constant 0 : index
    %62 = vector.load %arg6[%c0_25, %c0_26, %c0_27] : memref<2x4x4xf32, #tpu.memory_space<vmem>>, vector<2x1x4xf32>
    %63 = vector.shape_cast %62 : vector<2x1x4xf32> to vector<2x4xf32>
    %64 = vector.shape_cast %61 : vector<2x4xf32> to vector<2x1x4xf32>
    tpu.vector_store %arg6[%c0_25, %c0_26, %c0_27], %64 {strides = array<i32>} : memref<2x4x4xf32, #tpu.memory_space<vmem>>, vector<2x1x4xf32>,
    %c0_28 = arith.constant 0 : index
    %c0_29 = arith.constant 0 : index
    %65 = vector.load %arg3[%c0_28, %c0_29] : memref<16x256xf32, #tpu.memory_space<vmem>>, vector<16x256xf32>
    %cst_30 = arith.constant dense<0.000000e+00> : vector<2x256xf32>
    %66 = tpu.matmul %15, %65, %cst_30 {dimension_numbers = #tpu.dot_dimension_numbers<[1], [0], [0], [1], [0, 0, 1, 1], [], []>} : vector<2x16xf32>, vector<16x256xf32>, vector<2x256xf32> -> vector<2x256xf32>
    %c0_31 = arith.constant 0 : index
    %c0_32 = arith.constant 0 : index
    %67 = vector.load %arg4[%c0_31, %c0_32] : memref<16x256xf32, #tpu.memory_space<vmem>>, vector<16x256xf32>
    %cst_33 = arith.constant dense<0.000000e+00> : vector<2x256xf32>
    %68 = tpu.matmul %16, %67, %cst_33 {dimension_numbers = #tpu.dot_dimension_numbers<[1], [0], [0], [1], [0, 0, 1, 1], [], []>} : vector<2x16xf32>, vector<16x256xf32>, vector<2x256xf32> -> vector<2x256xf32>
    %69 = arith.mulf %66, %68 : vector<2x256xf32>
    %c0_34 = arith.constant 0 : index
    %c0_35 = arith.constant 0 : index
    %c0_36 = arith.constant 0 : index
    %70 = vector.load %arg7[%c0_34, %c0_35, %c0_36] : memref<2x4x256xf32, #tpu.memory_space<vmem>>, vector<2x1x256xf32>
    %71 = vector.shape_cast %70 : vector<2x1x256xf32> to vector<2x256xf32>
    %72 = vector.shape_cast %69 : vector<2x256xf32> to vector<2x1x256xf32>
    tpu.vector_store %arg7[%c0_34, %c0_35, %c0_36], %72 {strides = array<i32>} : memref<2x4x256xf32, #tpu.memory_space<vmem>>, vector<2x1x256xf32>,
    %73 = arith.mulf %56, %41 : vector<1x4xf32>
    %74 = vector.broadcast %57 : f32 to vector<1x4xf32>
    %75 = arith.mulf %74, %73 : vector<1x4xf32>
    %76 = arith.addf %2, %75 : vector<1x4xf32>
    %77 = vector.extract_strided_slice %1 {offsets = [0, 0], sizes = [2, 4], strides = [1, 1]} : vector<2x36xf32> to vector<2x4xf32>
    %78 = arith.mulf %20, %24 : vector<2x1xf32>
    %79 = vector.broadcast %78 : vector<2x1xf32> to vector<2x4xf32>
    %80 = arith.mulf %14, %79 : vector<2x4xf32>
    %81 = vector.broadcast %41 : vector<1x4xf32> to vector<2x4xf32>
    %82 = arith.subf %80, %81 : vector<2x4xf32>
    %83 = vector.broadcast %56 : vector<1x4xf32> to vector<2x4xf32>
    %84 = arith.mulf %83, %82 : vector<2x4xf32>
    %85 = arith.subf %77, %84 : vector<2x4xf32>
    %86 = vector.broadcast %56 : vector<1x4xf32> to vector<2x4xf32>
    %87 = arith.mulf %86, %14 : vector<2x4xf32>
    %cst_37 = arith.constant dense<0.000000e+00> : vector<2xf32>
    %88 = vector.multi_reduction <add>, %87, %cst_37 [1] : vector<2x4xf32> to vector<2xf32>
    %89 = vector.shape_cast %88 : vector<2xf32> to vector<2x1xf32>
    %cst_38 = arith.constant 4.000000e+00 : f32
    %90 = vector.broadcast %cst_38 : f32 to vector<2x1xf32>
    %91 = arith.divf %89, %90 : vector<2x1xf32>
    %92 = arith.mulf %56, %41 : vector<1x4xf32>
    %cst_39 = arith.constant dense<0.000000e+00> : vector<1xf32>
    %93 = vector.multi_reduction <add>, %92, %cst_39 [1] : vector<1x4xf32> to vector<1xf32>
    %94 = vector.shape_cast %93 : vector<1xf32> to vector<1x1xf32>
    %cst_40 = arith.constant 4.000000e+00 : f32
    %95 = vector.broadcast %cst_40 : f32 to vector<1x1xf32>
    %96 = arith.divf %94, %95 : vector<1x1xf32>
    %97 = vector.extract_strided_slice %1 {offsets = [0, 4], sizes = [2, 16], strides = [1, 1]} : vector<2x36xf32> to vector<2x16xf32>
    %98 = arith.mulf %24, %91 : vector<2x1xf32>
    %99 = vector.broadcast %98 : vector<2x1xf32> to vector<2x16xf32>
    %100 = arith.mulf %15, %99 : vector<2x16xf32>
    %101 = vector.broadcast %96 : vector<1x1xf32> to vector<2x16xf32>
    %102 = arith.subf %100, %101 : vector<2x16xf32>
    %103 = arith.subf %97, %102 : vector<2x16xf32>
    %104 = vector.extract_strided_slice %1 {offsets = [0, 20], sizes = [2, 16], strides = [1, 1]} : vector<2x36xf32> to vector<2x16xf32>
    %105 = arith.mulf %20, %91 : vector<2x1xf32>
    %106 = vector.broadcast %105 : vector<2x1xf32> to vector<2x16xf32>
    %107 = arith.mulf %16, %106 : vector<2x16xf32>
    %108 = vector.broadcast %96 : vector<1x1xf32> to vector<2x16xf32>
    %109 = arith.subf %107, %108 : vector<2x16xf32>
    %110 = arith.subf %104, %109 : vector<2x16xf32>
    %111 = tpu.concatenate %85, %103, %110 in 1 : vector<2x4xf32>, vector<2x16xf32>, vector<2x16xf32> -> vector<2x36xf32>
    %c1 = arith.constant 1 : index
    %c0_41 = arith.constant 0 : index
    %c0_42 = arith.constant 0 : index
    %112 = vector.load %arg1[%c1, %c0_41, %c0_42] : memref<3x36x36xf32, #tpu.memory_space<vmem>>, vector<1x36x36xf32>
    %113 = vector.shape_cast %112 : vector<1x36x36xf32> to vector<36x36xf32>
    %cst_43 = arith.constant dense<0.000000e+00> : vector<2x36xf32>
    %114 = tpu.matmul %111, %113, %cst_43 {dimension_numbers = #tpu.dot_dimension_numbers<[1], [0], [0], [1], [0, 0, 1, 1], [], []>} : vector<2x36xf32>, vector<36x36xf32>, vector<2x36xf32> -> vector<2x36xf32>
    %c1_44 = arith.constant 1 : index
    %c0_45 = arith.constant 0 : index
    %c0_46 = arith.constant 0 : index
    %115 = vector.load %arg2[%c1_44, %c0_45, %c0_46] : memref<3x1x36xf32, #tpu.memory_space<vmem>>, vector<1x1x36xf32>
    %116 = vector.shape_cast %115 : vector<1x1x36xf32> to vector<1x36xf32>
    %117 = vector.broadcast %116 : vector<1x36xf32> to vector<2x36xf32>
    %118 = arith.addf %114, %117 : vector<2x36xf32>
    %119 = math.absf %118 : vector<2x36xf32>
    %cst_47 = arith.constant 1.000000e+00 : f32
    %120 = vector.broadcast %cst_47 : f32 to vector<2x36xf32>
    %121 = arith.addf %120, %119 : vector<2x36xf32>
    %122 = arith.divf %118, %121 : vector<2x36xf32>
    %123 = vector.extract_strided_slice %122 {offsets = [0, 0], sizes = [2, 4], strides = [1, 1]} : vector<2x36xf32> to vector<2x4xf32>
    %124 = vector.extract_strided_slice %122 {offsets = [0, 4], sizes = [2, 16], strides = [1, 1]} : vector<2x36xf32> to vector<2x16xf32>
    %125 = vector.extract_strided_slice %122 {offsets = [0, 20], sizes = [2, 16], strides = [1, 1]} : vector<2x36xf32> to vector<2x16xf32>
    %cst_48 = arith.constant dense<0.000000e+00> : vector<2xf32>
    %126 = vector.multi_reduction <add>, %124, %cst_48 [1] : vector<2x16xf32> to vector<2xf32>
    %127 = vector.shape_cast %126 : vector<2xf32> to vector<2x1xf32>
    %cst_49 = arith.constant 1.600000e+01 : f32
    %128 = vector.broadcast %cst_49 : f32 to vector<2x1xf32>
    %129 = arith.divf %127, %128 : vector<2x1xf32>
    %cst_50 = arith.constant dense<0.000000e+00> : vector<2xf32>
    %130 = vector.multi_reduction <add>, %125, %cst_50 [1] : vector<2x16xf32> to vector<2xf32>
    %131 = vector.shape_cast %130 : vector<2xf32> to vector<2x1xf32>
    %cst_51 = arith.constant 1.600000e+01 : f32
    %132 = vector.broadcast %cst_51 : f32 to vector<2x1xf32>
    %133 = arith.divf %131, %132 : vector<2x1xf32>
    %134 = arith.mulf %124, %124 : vector<2x16xf32>
    %cst_52 = arith.constant dense<0.000000e+00> : vector<2xf32>
    %135 = vector.multi_reduction <add>, %134, %cst_52 [1] : vector<2x16xf32> to vector<2xf32>
    %136 = vector.shape_cast %135 : vector<2xf32> to vector<2x1xf32>
    %cst_53 = arith.constant 1.600000e+01 : f32
    %137 = vector.broadcast %cst_53 : f32 to vector<2x1xf32>
    %138 = arith.divf %136, %137 : vector<2x1xf32>
    %139 = arith.mulf %125, %125 : vector<2x16xf32>
    %cst_54 = arith.constant dense<0.000000e+00> : vector<2xf32>
    %140 = vector.multi_reduction <add>, %139, %cst_54 [1] : vector<2x16xf32> to vector<2xf32>
    %141 = vector.shape_cast %140 : vector<2xf32> to vector<2x1xf32>
    %cst_55 = arith.constant 1.600000e+01 : f32
    %142 = vector.broadcast %cst_55 : f32 to vector<2x1xf32>
    %143 = arith.divf %141, %142 : vector<2x1xf32>
    %144 = arith.mulf %129, %133 : vector<2x1xf32>
    %145 = vector.broadcast %144 : vector<2x1xf32> to vector<2x4xf32>
    %146 = arith.mulf %123, %145 : vector<2x4xf32>
    %cst_56 = arith.constant dense<0.000000e+00> : vector<4xf32>
    %147 = vector.multi_reduction <add>, %146, %cst_56 [0] : vector<2x4xf32> to vector<4xf32>
    %148 = vector.shape_cast %147 : vector<4xf32> to vector<1x4xf32>
    %cst_57 = arith.constant 2.000000e+00 : f32
    %149 = vector.broadcast %cst_57 : f32 to vector<1x4xf32>
    %150 = arith.divf %148, %149 : vector<1x4xf32>
    %151 = arith.mulf %123, %123 : vector<2x4xf32>
    %152 = arith.mulf %138, %143 : vector<2x1xf32>
    %153 = vector.broadcast %152 : vector<2x1xf32> to vector<2x4xf32>
    %154 = arith.mulf %151, %153 : vector<2x4xf32>
    %cst_58 = arith.constant dense<0.000000e+00> : vector<4xf32>
    %155 = vector.multi_reduction <add>, %154, %cst_58 [0] : vector<2x4xf32> to vector<4xf32>
    %156 = vector.shape_cast %155 : vector<4xf32> to vector<1x4xf32>
    %cst_59 = arith.constant 2.000000e+00 : f32
    %157 = vector.broadcast %cst_59 : f32 to vector<1x4xf32>
    %158 = arith.divf %156, %157 : vector<1x4xf32>
    %159 = arith.mulf %150, %150 : vector<1x4xf32>
    %160 = arith.subf %158, %159 : vector<1x4xf32>
    %cst_60 = arith.constant 0.000000e+00 : f32
    %161 = vector.broadcast %cst_60 : f32 to vector<1x4xf32>
    %162 = arith.maximumf %160, %161 : vector<1x4xf32>
    %cst_61 = arith.constant 9.99999974E-6 : f32
    %163 = vector.broadcast %cst_61 : f32 to vector<1x4xf32>
    %164 = arith.addf %162, %163 : vector<1x4xf32>
    %165 = math.rsqrt %164 : vector<1x4xf32>
    %c1_62 = arith.constant 1 : index
    %166 = memref.load %arg5[%c1_62] : memref<3xf32, #tpu.memory_space<smem>>
    %167 = vector.broadcast %166 : f32 to vector<1x4xf32>
    %168 = arith.mulf %167, %165 : vector<1x4xf32>
    %169 = vector.broadcast %168 : vector<1x4xf32> to vector<2x4xf32>
    %170 = arith.mulf %169, %123 : vector<2x4xf32>
    %c0_63 = arith.constant 0 : index
    %c1_64 = arith.constant 1 : index
    %c0_65 = arith.constant 0 : index
    %171 = vector.load %arg6[%c0_63, %c1_64, %c0_65] : memref<2x4x4xf32, #tpu.memory_space<vmem>>, vector<2x1x4xf32>
    %172 = vector.shape_cast %171 : vector<2x1x4xf32> to vector<2x4xf32>
    %173 = vector.shape_cast %170 : vector<2x4xf32> to vector<2x1x4xf32>
    tpu.vector_store %arg6[%c0_63, %c1_64, %c0_65], %173 {strides = array<i32>} : memref<2x4x4xf32, #tpu.memory_space<vmem>>, vector<2x1x4xf32>,
    %c0_66 = arith.constant 0 : index
    %c0_67 = arith.constant 0 : index
    %174 = vector.load %arg3[%c0_66, %c0_67] : memref<16x256xf32, #tpu.memory_space<vmem>>, vector<16x256xf32>
    %cst_68 = arith.constant dense<0.000000e+00> : vector<2x256xf32>
    %175 = tpu.matmul %124, %174, %cst_68 {dimension_numbers = #tpu.dot_dimension_numbers<[1], [0], [0], [1], [0, 0, 1, 1], [], []>} : vector<2x16xf32>, vector<16x256xf32>, vector<2x256xf32> -> vector<2x256xf32>
    %c0_69 = arith.constant 0 : index
    %c0_70 = arith.constant 0 : index
    %176 = vector.load %arg4[%c0_69, %c0_70] : memref<16x256xf32, #tpu.memory_space<vmem>>, vector<16x256xf32>
    %cst_71 = arith.constant dense<0.000000e+00> : vector<2x256xf32>
    %177 = tpu.matmul %125, %176, %cst_71 {dimension_numbers = #tpu.dot_dimension_numbers<[1], [0], [0], [1], [0, 0, 1, 1], [], []>} : vector<2x16xf32>, vector<16x256xf32>, vector<2x256xf32> -> vector<2x256xf32>
    %178 = arith.mulf %175, %177 : vector<2x256xf32>
    %c0_72 = arith.constant 0 : index
    %c1_73 = arith.constant 1 : index
    %c0_74 = arith.constant 0 : index
    %179 = vector.load %arg7[%c0_72, %c1_73, %c0_74] : memref<2x4x256xf32, #tpu.memory_space<vmem>>, vector<2x1x256xf32>
    %180 = vector.shape_cast %179 : vector<2x1x256xf32> to vector<2x256xf32>
    %181 = vector.shape_cast %178 : vector<2x256xf32> to vector<2x1x256xf32>
    tpu.vector_store %arg7[%c0_72, %c1_73, %c0_74], %181 {strides = array<i32>} : memref<2x4x256xf32, #tpu.memory_space<vmem>>, vector<2x1x256xf32>,
    %182 = arith.mulf %165, %150 : vector<1x4xf32>
    %183 = vector.broadcast %166 : f32 to vector<1x4xf32>
    %184 = arith.mulf %183, %182 : vector<1x4xf32>
    %185 = arith.addf %76, %184 : vector<1x4xf32>
    %186 = vector.extract_strided_slice %111 {offsets = [0, 0], sizes = [2, 4], strides = [1, 1]} : vector<2x36xf32> to vector<2x4xf32>
    %187 = arith.mulf %129, %133 : vector<2x1xf32>
    %188 = vector.broadcast %187 : vector<2x1xf32> to vector<2x4xf32>
    %189 = arith.mulf %123, %188 : vector<2x4xf32>
    %190 = vector.broadcast %150 : vector<1x4xf32> to vector<2x4xf32>
    %191 = arith.subf %189, %190 : vector<2x4xf32>
    %192 = vector.broadcast %165 : vector<1x4xf32> to vector<2x4xf32>
    %193 = arith.mulf %192, %191 : vector<2x4xf32>
    %194 = arith.subf %186, %193 : vector<2x4xf32>
    %195 = vector.broadcast %165 : vector<1x4xf32> to vector<2x4xf32>
    %196 = arith.mulf %195, %123 : vector<2x4xf32>
    %cst_75 = arith.constant dense<0.000000e+00> : vector<2xf32>
    %197 = vector.multi_reduction <add>, %196, %cst_75 [1] : vector<2x4xf32> to vector<2xf32>
    %198 = vector.shape_cast %197 : vector<2xf32> to vector<2x1xf32>
    %cst_76 = arith.constant 4.000000e+00 : f32
    %199 = vector.broadcast %cst_76 : f32 to vector<2x1xf32>
    %200 = arith.divf %198, %199 : vector<2x1xf32>
    %201 = arith.mulf %165, %150 : vector<1x4xf32>
    %cst_77 = arith.constant dense<0.000000e+00> : vector<1xf32>
    %202 = vector.multi_reduction <add>, %201, %cst_77 [1] : vector<1x4xf32> to vector<1xf32>
    %203 = vector.shape_cast %202 : vector<1xf32> to vector<1x1xf32>
    %cst_78 = arith.constant 4.000000e+00 : f32
    %204 = vector.broadcast %cst_78 : f32 to vector<1x1xf32>
    %205 = arith.divf %203, %204 : vector<1x1xf32>
    %206 = vector.extract_strided_slice %111 {offsets = [0, 4], sizes = [2, 16], strides = [1, 1]} : vector<2x36xf32> to vector<2x16xf32>
    %207 = arith.mulf %133, %200 : vector<2x1xf32>
    %208 = vector.broadcast %207 : vector<2x1xf32> to vector<2x16xf32>
    %209 = arith.mulf %124, %208 : vector<2x16xf32>
    %210 = vector.broadcast %205 : vector<1x1xf32> to vector<2x16xf32>
    %211 = arith.subf %209, %210 : vector<2x16xf32>
    %212 = arith.subf %206, %211 : vector<2x16xf32>
    %213 = vector.extract_strided_slice %111 {offsets = [0, 20], sizes = [2, 16], strides = [1, 1]} : vector<2x36xf32> to vector<2x16xf32>
    %214 = arith.mulf %129, %200 : vector<2x1xf32>
    %215 = vector.broadcast %214 : vector<2x1xf32> to vector<2x16xf32>
    %216 = arith.mulf %125, %215 : vector<2x16xf32>
    %217 = vector.broadcast %205 : vector<1x1xf32> to vector<2x16xf32>
    %218 = arith.subf %216, %217 : vector<2x16xf32>
    %219 = arith.subf %213, %218 : vector<2x16xf32>
    %220 = tpu.concatenate %194, %212, %219 in 1 : vector<2x4xf32>, vector<2x16xf32>, vector<2x16xf32> -> vector<2x36xf32>
    %c2 = arith.constant 2 : index
    %c0_79 = arith.constant 0 : index
    %c0_80 = arith.constant 0 : index
    %221 = vector.load %arg1[%c2, %c0_79, %c0_80] : memref<3x36x36xf32, #tpu.memory_space<vmem>>, vector<1x36x36xf32>
    %222 = vector.shape_cast %221 : vector<1x36x36xf32> to vector<36x36xf32>
    %cst_81 = arith.constant dense<0.000000e+00> : vector<2x36xf32>
    %223 = tpu.matmul %220, %222, %cst_81 {dimension_numbers = #tpu.dot_dimension_numbers<[1], [0], [0], [1], [0, 0, 1, 1], [], []>} : vector<2x36xf32>, vector<36x36xf32>, vector<2x36xf32> -> vector<2x36xf32>
    %c2_82 = arith.constant 2 : index
    %c0_83 = arith.constant 0 : index
    %c0_84 = arith.constant 0 : index
    %224 = vector.load %arg2[%c2_82, %c0_83, %c0_84] : memref<3x1x36xf32, #tpu.memory_space<vmem>>, vector<1x1x36xf32>
    %225 = vector.shape_cast %224 : vector<1x1x36xf32> to vector<1x36xf32>
    %226 = vector.broadcast %225 : vector<1x36xf32> to vector<2x36xf32>
    %227 = arith.addf %223, %226 : vector<2x36xf32>
    %228 = math.absf %227 : vector<2x36xf32>
    %cst_85 = arith.constant 1.000000e+00 : f32
    %229 = vector.broadcast %cst_85 : f32 to vector<2x36xf32>
    %230 = arith.addf %229, %228 : vector<2x36xf32>
    %231 = arith.divf %227, %230 : vector<2x36xf32>
    %232 = vector.extract_strided_slice %231 {offsets = [0, 0], sizes = [2, 4], strides = [1, 1]} : vector<2x36xf32> to vector<2x4xf32>
    %233 = vector.extract_strided_slice %231 {offsets = [0, 4], sizes = [2, 16], strides = [1, 1]} : vector<2x36xf32> to vector<2x16xf32>
    %234 = vector.extract_strided_slice %231 {offsets = [0, 20], sizes = [2, 16], strides = [1, 1]} : vector<2x36xf32> to vector<2x16xf32>
    %cst_86 = arith.constant dense<0.000000e+00> : vector<2xf32>
    %235 = vector.multi_reduction <add>, %233, %cst_86 [1] : vector<2x16xf32> to vector<2xf32>
    %236 = vector.shape_cast %235 : vector<2xf32> to vector<2x1xf32>
    %cst_87 = arith.constant 1.600000e+01 : f32
    %237 = vector.broadcast %cst_87 : f32 to vector<2x1xf32>
    %238 = arith.divf %236, %237 : vector<2x1xf32>
    %cst_88 = arith.constant dense<0.000000e+00> : vector<2xf32>
    %239 = vector.multi_reduction <add>, %234, %cst_88 [1] : vector<2x16xf32> to vector<2xf32>
    %240 = vector.shape_cast %239 : vector<2xf32> to vector<2x1xf32>
    %cst_89 = arith.constant 1.600000e+01 : f32
    %241 = vector.broadcast %cst_89 : f32 to vector<2x1xf32>
    %242 = arith.divf %240, %241 : vector<2x1xf32>
    %243 = arith.mulf %233, %233 : vector<2x16xf32>
    %cst_90 = arith.constant dense<0.000000e+00> : vector<2xf32>
    %244 = vector.multi_reduction <add>, %243, %cst_90 [1] : vector<2x16xf32> to vector<2xf32>
    %245 = vector.shape_cast %244 : vector<2xf32> to vector<2x1xf32>
    %cst_91 = arith.constant 1.600000e+01 : f32
    %246 = vector.broadcast %cst_91 : f32 to vector<2x1xf32>
    %247 = arith.divf %245, %246 : vector<2x1xf32>
    %248 = arith.mulf %234, %234 : vector<2x16xf32>
    %cst_92 = arith.constant dense<0.000000e+00> : vector<2xf32>
    %249 = vector.multi_reduction <add>, %248, %cst_92 [1] : vector<2x16xf32> to vector<2xf32>
    %250 = vector.shape_cast %249 : vector<2xf32> to vector<2x1xf32>
    %cst_93 = arith.constant 1.600000e+01 : f32
    %251 = vector.broadcast %cst_93 : f32 to vector<2x1xf32>
    %252 = arith.divf %250, %251 : vector<2x1xf32>
    %253 = arith.mulf %238, %242 : vector<2x1xf32>
    %254 = vector.broadcast %253 : vector<2x1xf32> to vector<2x4xf32>
    %255 = arith.mulf %232, %254 : vector<2x4xf32>
    %cst_94 = arith.constant dense<0.000000e+00> : vector<4xf32>
    %256 = vector.multi_reduction <add>, %255, %cst_94 [0] : vector<2x4xf32> to vector<4xf32>
    %257 = vector.shape_cast %256 : vector<4xf32> to vector<1x4xf32>
    %cst_95 = arith.constant 2.000000e+00 : f32
    %258 = vector.broadcast %cst_95 : f32 to vector<1x4xf32>
    %259 = arith.divf %257, %258 : vector<1x4xf32>
    %260 = arith.mulf %232, %232 : vector<2x4xf32>
    %261 = arith.mulf %247, %252 : vector<2x1xf32>
    %262 = vector.broadcast %261 : vector<2x1xf32> to vector<2x4xf32>
    %263 = arith.mulf %260, %262 : vector<2x4xf32>
    %cst_96 = arith.constant dense<0.000000e+00> : vector<4xf32>
    %264 = vector.multi_reduction <add>, %263, %cst_96 [0] : vector<2x4xf32> to vector<4xf32>
    %265 = vector.shape_cast %264 : vector<4xf32> to vector<1x4xf32>
    %cst_97 = arith.constant 2.000000e+00 : f32
    %266 = vector.broadcast %cst_97 : f32 to vector<1x4xf32>
    %267 = arith.divf %265, %266 : vector<1x4xf32>
    %268 = arith.mulf %259, %259 : vector<1x4xf32>
    %269 = arith.subf %267, %268 : vector<1x4xf32>
    %cst_98 = arith.constant 0.000000e+00 : f32
    %270 = vector.broadcast %cst_98 : f32 to vector<1x4xf32>
    %271 = arith.maximumf %269, %270 : vector<1x4xf32>
    %cst_99 = arith.constant 9.99999974E-6 : f32
    %272 = vector.broadcast %cst_99 : f32 to vector<1x4xf32>
    %273 = arith.addf %271, %272 : vector<1x4xf32>
    %274 = math.rsqrt %273 : vector<1x4xf32>
    %c2_100 = arith.constant 2 : index
    %275 = memref.load %arg5[%c2_100] : memref<3xf32, #tpu.memory_space<smem>>
    %276 = vector.broadcast %275 : f32 to vector<1x4xf32>
    %277 = arith.mulf %276, %274 : vector<1x4xf32>
    %278 = vector.broadcast %277 : vector<1x4xf32> to vector<2x4xf32>
    %279 = arith.mulf %278, %232 : vector<2x4xf32>
    %c0_101 = arith.constant 0 : index
    %c2_102 = arith.constant 2 : index
    %c0_103 = arith.constant 0 : index
    %280 = vector.load %arg6[%c0_101, %c2_102, %c0_103] : memref<2x4x4xf32, #tpu.memory_space<vmem>>, vector<2x1x4xf32>
    %281 = vector.shape_cast %280 : vector<2x1x4xf32> to vector<2x4xf32>
    %282 = vector.shape_cast %279 : vector<2x4xf32> to vector<2x1x4xf32>
    tpu.vector_store %arg6[%c0_101, %c2_102, %c0_103], %282 {strides = array<i32>} : memref<2x4x4xf32, #tpu.memory_space<vmem>>, vector<2x1x4xf32>,
    %c0_104 = arith.constant 0 : index
    %c0_105 = arith.constant 0 : index
    %283 = vector.load %arg3[%c0_104, %c0_105] : memref<16x256xf32, #tpu.memory_space<vmem>>, vector<16x256xf32>
    %cst_106 = arith.constant dense<0.000000e+00> : vector<2x256xf32>
    %284 = tpu.matmul %233, %283, %cst_106 {dimension_numbers = #tpu.dot_dimension_numbers<[1], [0], [0], [1], [0, 0, 1, 1], [], []>} : vector<2x16xf32>, vector<16x256xf32>, vector<2x256xf32> -> vector<2x256xf32>
    %c0_107 = arith.constant 0 : index
    %c0_108 = arith.constant 0 : index
    %285 = vector.load %arg4[%c0_107, %c0_108] : memref<16x256xf32, #tpu.memory_space<vmem>>, vector<16x256xf32>
    %cst_109 = arith.constant dense<0.000000e+00> : vector<2x256xf32>
    %286 = tpu.matmul %234, %285, %cst_109 {dimension_numbers = #tpu.dot_dimension_numbers<[1], [0], [0], [1], [0, 0, 1, 1], [], []>} : vector<2x16xf32>, vector<16x256xf32>, vector<2x256xf32> -> vector<2x256xf32>
    %287 = arith.mulf %284, %286 : vector<2x256xf32>
    %c0_110 = arith.constant 0 : index
    %c2_111 = arith.constant 2 : index
    %c0_112 = arith.constant 0 : index
    %288 = vector.load %arg7[%c0_110, %c2_111, %c0_112] : memref<2x4x256xf32, #tpu.memory_space<vmem>>, vector<2x1x256xf32>
    %289 = vector.shape_cast %288 : vector<2x1x256xf32> to vector<2x256xf32>
    %290 = vector.shape_cast %287 : vector<2x256xf32> to vector<2x1x256xf32>
    tpu.vector_store %arg7[%c0_110, %c2_111, %c0_112], %290 {strides = array<i32>} : memref<2x4x256xf32, #tpu.memory_space<vmem>>, vector<2x1x256xf32>,
    %291 = arith.mulf %274, %259 : vector<1x4xf32>
    %292 = vector.broadcast %275 : f32 to vector<1x4xf32>
    %293 = arith.mulf %292, %291 : vector<1x4xf32>
    %294 = arith.addf %185, %293 : vector<1x4xf32>
    %cst_113 = arith.constant 0.000000e+00 : f32
    %295 = vector.broadcast %cst_113 : f32 to vector<1x4xf32>
    %296 = arith.subf %295, %294 : vector<1x4xf32>
    %297 = vector.shape_cast %296 : vector<1x4xf32> to vector<1x4xf32>
    %298 = vector.broadcast %297 : vector<1x4xf32> to vector<2x4xf32>
    %c0_114 = arith.constant 0 : index
    %c3 = arith.constant 3 : index
    %c0_115 = arith.constant 0 : index
    %299 = vector.load %arg6[%c0_114, %c3, %c0_115] : memref<2x4x4xf32, #tpu.memory_space<vmem>>, vector<2x1x4xf32>
    %300 = vector.shape_cast %299 : vector<2x1x4xf32> to vector<2x4xf32>
    %301 = vector.shape_cast %298 : vector<2x4xf32> to vector<2x1x4xf32>
    tpu.vector_store %arg6[%c0_114, %c3, %c0_115], %301 {strides = array<i32>} : memref<2x4x4xf32, #tpu.memory_space<vmem>>, vector<2x1x4xf32>,
    %cst_116 = arith.constant 1.000000e+00 : f32
    %302 = vector.broadcast %cst_116 : f32 to vector<2x256xf32>
    %c0_117 = arith.constant 0 : index
    %c3_118 = arith.constant 3 : index
    %c0_119 = arith.constant 0 : index
    %303 = vector.load %arg7[%c0_117, %c3_118, %c0_119] : memref<2x4x256xf32, #tpu.memory_space<vmem>>, vector<2x1x256xf32>
    %304 = vector.shape_cast %303 : vector<2x1x256xf32> to vector<2x256xf32>
    %305 = vector.shape_cast %302 : vector<2x256xf32> to vector<2x1x256xf32>
    tpu.vector_store %arg7[%c0_117, %c3_118, %c0_119], %305 {strides = array<i32>} : memref<2x4x256xf32, #tpu.memory_space<vmem>>, vector<2x1x256xf32>,
    return
  }
}

module attributes {stable_mosaic.version = 11 : i64} {
  func.func @_apply_kernel(%arg0: i32, %arg1: i32, %arg2: memref<1x4x256xf32, #tpu.memory_space<vmem>>, %arg3: memref<1x4x4xf32, #tpu.memory_space<vmem>>, %arg4: memref<1x4x256xf32, #tpu.memory_space<vmem>>, %arg5: memref<1x4x256xf32, #tpu.memory_space<vmem>>) attributes {dimension_semantics = [#tpu.dimension_semantics<parallel>, #tpu.dimension_semantics<parallel>], iteration_bounds = array<i64: 2, 1>, scalar_prefetch = 0 : i64, scratch_operands = 0 : i64, tpu.core_type = #tpu.core_type<tc>, window_params = [{transform_indices = @transform_0, window_bounds = array<i64: 1, 4, 256>}, {transform_indices = @transform_1, window_bounds = array<i64: 1, 4, 4>}, {transform_indices = @transform_2, window_bounds = array<i64: 1, 4, 256>}, {transform_indices = @transform_3, window_bounds = array<i64: 1, 4, 256>}]} {
    %c0 = arith.constant 0 : index
    %c0_0 = arith.constant 0 : index
    %c0_1 = arith.constant 0 : index
    %0 = vector.load %arg3[%c0, %c0_0, %c0_1] : memref<1x4x4xf32, #tpu.memory_space<vmem>>, vector<1x4x4xf32>
    %1 = vector.shape_cast %0 : vector<1x4x4xf32> to vector<4x4xf32>
    %c0_2 = arith.constant 0 : index
    %c0_3 = arith.constant 0 : index
    %c0_4 = arith.constant 0 : index
    %2 = vector.load %arg4[%c0_2, %c0_3, %c0_4] : memref<1x4x256xf32, #tpu.memory_space<vmem>>, vector<1x4x256xf32>
    %3 = vector.shape_cast %2 : vector<1x4x256xf32> to vector<4x256xf32>
    %cst = arith.constant dense<0.000000e+00> : vector<4x256xf32>
    %4 = tpu.matmul %1, %3, %cst {dimension_numbers = #tpu.dot_dimension_numbers<[1], [0], [0], [1], [0, 0, 1, 1], [], []>} : vector<4x4xf32>, vector<4x256xf32>, vector<4x256xf32> -> vector<4x256xf32>
    %c0_5 = arith.constant 0 : index
    %c0_6 = arith.constant 0 : index
    %c0_7 = arith.constant 0 : index
    %5 = vector.load %arg2[%c0_5, %c0_6, %c0_7] : memref<1x4x256xf32, #tpu.memory_space<vmem>>, vector<1x4x256xf32>
    %6 = vector.shape_cast %5 : vector<1x4x256xf32> to vector<4x256xf32>
    %7 = arith.addf %6, %4 : vector<4x256xf32>
    %c0_8 = arith.constant 0 : index
    %c0_9 = arith.constant 0 : index
    %c0_10 = arith.constant 0 : index
    %8 = vector.load %arg5[%c0_8, %c0_9, %c0_10] : memref<1x4x256xf32, #tpu.memory_space<vmem>>, vector<1x4x256xf32>
    %9 = vector.shape_cast %8 : vector<1x4x256xf32> to vector<4x256xf32>
    %10 = vector.shape_cast %7 : vector<4x256xf32> to vector<1x4x256xf32>
    tpu.vector_store %arg5[%c0_8, %c0_9, %c0_10], %10 {strides = array<i32>} : memref<1x4x256xf32, #tpu.memory_space<vmem>>, vector<1x4x256xf32>,
    return
  }
  func.func @transform_0(%arg0: i32, %arg1: i32) -> (i32, i32, i32) {
    %c0_i32 = arith.constant 0 : i32
    %c0_i32_0 = arith.constant 0 : i32
    return %arg0, %c0_i32, %arg1 : i32, i32, i32
  }
  func.func @transform_1(%arg0: i32, %arg1: i32) -> (i32, i32, i32) {
    %c0_i32 = arith.constant 0 : i32
    %c0_i32_0 = arith.constant 0 : i32
    %c0_i32_1 = arith.constant 0 : i32
    return %arg0, %c0_i32, %c0_i32_0 : i32, i32, i32
  }
  func.func @transform_2(%arg0: i32, %arg1: i32) -> (i32, i32, i32) {
    %c0_i32 = arith.constant 0 : i32
    %c0_i32_0 = arith.constant 0 : i32
    return %arg0, %c0_i32, %arg1 : i32, i32, i32
  }
  func.func @transform_3(%arg0: i32, %arg1: i32) -> (i32, i32, i32) {
    %c0_i32 = arith.constant 0 : i32
    %c0_i32_0 = arith.constant 0 : i32
    return %arg0, %c0_i32, %arg1 : i32, i32, i32
  }
}

</mosaic_0001>

<bundles_post_ra>
// kernel: cp_lowrank_forward.3
= control target key start
LH: loop header
LB: loop body
LE: loop exit
PB: predicated region body
PF: predicated region fallthrough
CT: control target
= control target key end

     0   :  { %s473_s12 = smov 0   ;;  %s700_s0 = inlined_call_operand.vmem [shape: f32[2,4,256], index: 0, kind: input, shape index: {}]   ;;  %s701_s1 = inlined_call_operand.vmem [shape: f32[256,16], index: 1, kind: input, shape index: {}]   ;;  %s702_s2 = inlined_call_operand.vmem [shape: f32[256,16], index: 2, kind: input, shape index: {}]   ;;  %s703_s3 = inlined_call_operand.vmem [shape: f32[2,1,36], index: 3, kind: output, shape index: {}]  }
   0x1 LB: > { %s419_s13 = sadd.s32 4294967295, %s448_s12   ;;  %p423_p0 = scmp.ge.s32.totalorder %s448_s12, 1  ;;  %s448_s12 = sphi %s473_s12, %s13_s12  }
   0x2   : > { %p137_p1 = scmp.lt.s32.totalorder %s448_s12, 3 }
   0x4   : > { %p138_p2 = pnand %p423_p0, %p137_p1 }
   0x5   : > { %p543_p3 = scmp.lt.s32.totalorder (!%p138_p2), %s419_s13, 1  ;;  %s450_s22 = smov (!%p138_p2), 4  }
   0x6   : > { %141 = sbr.rel (%p138_p2) target bundleno = 311 (0x137), region = 32  ;;  %s451_s23 = smov (!%p138_p2), 20  }
   0xb   : > { %v222_v0 = vld [vmem:[%s701_s1 + $0x78] sm:$0xff]  ;;  %v221_v4 = vld [vmem:[%s701_s1 + $0x70] sm:$0xff]  ;;  %v220_v8 = vld [vmem:[%s701_s1 + $0x68] sm:$0xff]  ;;  %s706_s13 = smov (!%p543_p3, %s419_s13), 1  ;;  %vm174_vm0 = vcmask 1043456   ;;  %vm366_vm2 = vcmask 31744  }
   0xc   : > { %v238_v1 = vld [vmem:[%s701_s1 + $0xf8] sm:$0xff]  ;;  %239 = vmatpush.msra.mxu0 %v222_v0  ;;  %v237_v5 = vld [vmem:[%s701_s1 + $0xf0] sm:$0xff]  ;;  %v236_v9 = vld [vmem:[%s701_s1 + $0xe8] sm:$0xff]  ;;  %s428_s10 = sshll.u32 %s706_s13, 3  ;;  %vm368_vm3 = vcmask 162816   ;;  %s166_s26 = scalar_lea.vmem %s703_s3, %s706_s13  ;;  %vm370_vm4 = vcmask 286720  }
   0xd   : > { %v295_v2 = vld [vmem:[%s702_s2 + $0x78] sm:$0xff]  ;;  %259 = vmatpush.msra.mxu1 %v238_v1  ;;  %v294_v6 = vld [vmem:[%s702_s2 + $0x70] sm:$0xff]  ;;  %v293_v10 = vld [vmem:[%s702_s2 + $0x68] sm:$0xff]  ;;  %s163_s27 = scalar_lea.vmem %s700_s0, %s428_s10 }
   0xe   : > { %v311_v3 = vld [vmem:[%s702_s2 + $0xf8] sm:$0xff]  ;;  %312 = vmatpush.msra.mxu2 %v295_v2  ;;  %v310_v7 = vld [vmem:[%s702_s2 + $0xf0] sm:$0xff]  ;;  %240 = vmatpush.msra.mxu0 %v221_v4  ;;  %v309_v11 = vld [vmem:[%s702_s2 + $0xe8] sm:$0xff] }
   0xf   : > { %332 = vmatpush.msra.mxu3 %v311_v3  ;;  %260 = vmatpush.msra.mxu1 %v237_v5  ;;  %v219_v12 = vld [vmem:[%s701_s1 + $0x60] sm:$0xff]  ;;  %v218_v16 = vld [vmem:[%s701_s1 + $0x58] sm:$0xff]  ;;  %v217_v20 = vld [vmem:[%s701_s1 + $0x50] sm:$0xff] }
  0x10   : > { %313 = vmatpush.msra.mxu2 %v294_v6  ;;  %v235_v13 = vld [vmem:[%s701_s1 + $0xe0] sm:$0xff]  ;;  %241 = vmatpush.msra.mxu0 %v220_v8  ;;  %v234_v17 = vld [vmem:[%s701_s1 + $0xd8] sm:$0xff]  ;;  %v233_v21 = vld [vmem:[%s701_s1 + $0xd0] sm:$0xff] }
  0x11   : > { %333 = vmatpush.msra.mxu3 %v310_v7  ;;  %261 = vmatpush.msra.mxu1 %v236_v9  ;;  %v292_v14 = vld [vmem:[%s702_s2 + $0x60] sm:$0xff]  ;;  %v291_v18 = vld [vmem:[%s702_s2 + $0x58] sm:$0xff]  ;;  %v290_v22 = vld [vmem:[%s702_s2 + $0x50] sm:$0xff] }
  0x12   : > { %v308_v15 = vld [vmem:[%s702_s2 + $0xe0] sm:$0xff]  ;;  %314 = vmatpush.msra.mxu2 %v293_v10  ;;  %242 = vmatpush.msra.mxu0 %v219_v12  ;;  %v307_v19 = vld [vmem:[%s702_s2 + $0xd8] sm:$0xff]  ;;  %v306_v23 = vld [vmem:[%s702_s2 + $0xd0] sm:$0xff] }
  0x13   : > { %334 = vmatpush.msra.mxu3 %v309_v11  ;;  %262 = vmatpush.msra.mxu1 %v235_v13  ;;  %v216_v24 = vld [vmem:[%s701_s1 + $0x48] sm:$0xff]  ;;  %v215_v28 = vld [vmem:[%s701_s1 + $0x40] sm:$0xff]  ;;  %v214_v32 = vld [vmem:[%s701_s1 + $0x38] sm:$0xff] }
  0x14   : > { %315 = vmatpush.msra.mxu2 %v292_v14  ;;  %243 = vmatpush.msra.mxu0 %v218_v16  ;;  %v232_v25 = vld [vmem:[%s701_s1 + $0xc8] sm:$0xff]  ;;  %v231_v29 = vld [vmem:[%s701_s1 + $0xc0] sm:$0xff]  ;;  %v230_v33 = vld [vmem:[%s701_s1 + $0xb8] sm:$0xff] }
  0x15   : > { %335 = vmatpush.msra.mxu3 %v308_v15  ;;  %263 = vmatpush.msra.mxu1 %v234_v17  ;;  %v289_v26 = vld [vmem:[%s702_s2 + $0x48] sm:$0xff]  ;;  %v288_v30 = vld [vmem:[%s702_s2 + $0x40] sm:$0xff]  ;;  %v287_v34 = vld [vmem:[%s702_s2 + $0x38] sm:$0xff] }
  0x16   : > { %316 = vmatpush.msra.mxu2 %v291_v18  ;;  %244 = vmatpush.msra.mxu0 %v217_v20  ;;  %v305_v27 = vld [vmem:[%s702_s2 + $0xc8] sm:$0xff]  ;;  %v304_v31 = vld [vmem:[%s702_s2 + $0xc0] sm:$0xff]  ;;  %v303_v35 = vld [vmem:[%s702_s2 + $0xb8] sm:$0xff] }
  0x17   : > { %336 = vmatpush.msra.mxu3 %v307_v19  ;;  %264 = vmatpush.msra.mxu1 %v233_v21  ;;  %v213_v36 = vld [vmem:[%s701_s1 + $0x30] sm:$0xff]  ;;  %v212_v40 = vld [vmem:[%s701_s1 + $0x28] sm:$0xff]  ;;  %v211_v44 = vld [vmem:[%s701_s1 + $0x20] sm:$0xff] }
  0x18   : > { %317 = vmatpush.msra.mxu2 %v290_v22  ;;  %245 = vmatpush.msra.mxu0 %v216_v24  ;;  %v229_v37 = vld [vmem:[%s701_s1 + $0xb0] sm:$0xff]  ;;  %v228_v41 = vld [vmem:[%s701_s1 + $0xa8] sm:$0xff]  ;;  %v227_v45 = vld [vmem:[%s701_s1 + $0xa0] sm:$0xff] }
  0x19   : > { %337 = vmatpush.msra.mxu3 %v306_v23  ;;  %265 = vmatpush.msra.mxu1 %v232_v25  ;;  %v286_v38 = vld [vmem:[%s702_s2 + $0x30] sm:$0xff]  ;;  %v285_v42 = vld [vmem:[%s702_s2 + $0x28] sm:$0xff]  ;;  %v284_v46 = vld [vmem:[%s702_s2 + $0x20] sm:$0xff] }
  0x1a   : > { %318 = vmatpush.msra.mxu2 %v289_v26  ;;  %246 = vmatpush.msra.mxu0 %v215_v28  ;;  %v302_v39 = vld [vmem:[%s702_s2 + $0xb0] sm:$0xff]  ;;  %v301_v43 = vld [vmem:[%s702_s2 + $0xa8] sm:$0xff]  ;;  %v300_v47 = vld [vmem:[%s702_s2 + $0xa0] sm:$0xff] }
  0x1b   : > { %338 = vmatpush.msra.mxu3 %v305_v27  ;;  %266 = vmatpush.msra.mxu1 %v231_v29  ;;  %v167_v48 = vld [vmem:[%s163_s27] sm:$0xff]  ;;  %v210_v49 = vld [vmem:[%s701_s1 + $0x18] sm:$0xff]  ;;  %v209_v53 = vld [vmem:[%s701_s1 + $0x10] sm:$0xff] }
  0x1c   : > { %319 = vmatpush.msra.mxu2 %v288_v30  ;;  %247 = vmatpush.msra.mxu0 %v214_v32  ;;  %v226_v50 = vld [vmem:[%s701_s1 + $0x98] sm:$0xff]  ;;  %169 = vst [vmem:[#allocation1] ss:$2 sm:$0xff] %v167_v48  ;;  %v225_v54 = vld [vmem:[%s701_s1 + $0x90] sm:$0xff]  ;;  %v208_v57 = vld [vmem:[%s701_s1 + $0x8] sm:$0xff]  ;;  %v452_v30 = vmov 256.0  }
  0x1d   : > { %339 = vmatpush.msra.mxu3 %v304_v31  ;;  %267 = vmatpush.msra.mxu1 %v230_v33  ;;  %v283_v51 = vld [vmem:[%s702_s2 + $0x18] sm:$0xff]  ;;  %v282_v55 = vld [vmem:[%s702_s2 + $0x10] sm:$0xff]  ;;  %v224_v58 = vld [vmem:[%s701_s1 + $0x88] sm:$0xff]  ;;  %440 = vrcp.f32 %v452_v30 }
  0x1e   : > { %320 = vmatpush.msra.mxu2 %v287_v34  ;;  %248 = vmatpush.msra.mxu0 %v213_v36  ;;  %v299_v52 = vld [vmem:[%s702_s2 + $0x98] sm:$0xff]  ;;  %v298_v56 = vld [vmem:[%s702_s2 + $0x90] sm:$0xff]  ;;  %v281_v59 = vld [vmem:[%s702_s2 + $0x8] sm:$0xff] }
  0x1f   : > { %340 = vmatpush.msra.mxu3 %v303_v35  ;;  %268 = vmatpush.msra.mxu1 %v229_v37  ;;  %v297_v60 = vld [vmem:[%s702_s2 + $0x88] sm:$0xff]  ;;  %v207_v61 = vld [vmem:[%s701_s1] sm:$0xff]  ;;  %v354_v37 = vlaneseq }
  0x20   : > { %321 = vmatpush.msra.mxu2 %v286_v38  ;;  %249 = vmatpush.msra.mxu0 %v212_v40  ;;  %v223_v62 = vld [vmem:[%s701_s1 + $0x80] sm:$0xff] }
  0x21   : > { %341 = vmatpush.msra.mxu3 %v302_v39  ;;  %269 = vmatpush.msra.mxu1 %v228_v41  ;;  %v280_v63 = vld [vmem:[%s702_s2] sm:$0xff]  ;;  %v355_v39 = vand.u32 127, %v354_v37 }
  0x22   : > { %322 = vmatpush.msra.mxu2 %v285_v42  ;;  %250 = vmatpush.msra.mxu0 %v211_v44  ;;  %v296_v0 = vld [vmem:[%s702_s2 + $0x80] sm:$0xff] }
  0x23   : > { %342 = vmatpush.msra.mxu3 %v301_v43  ;;  %270 = vmatpush.msra.mxu1 %v227_v45  ;;  %v170_v1 = vld.sshfl [vmem:[#allocation1] sm:$0xff pattern:$0x75316420]  ;;  %v171_v2 = vld.sshfl [vmem:[#allocation1 + $0x8] sm:$0xff pattern:$0x75316420]  ;;  %v441_v31 = vpop.eup %440 }
  0x24   : > { %323 = vmatpush.msra.mxu2 %v284_v46  ;;  %251 = vmatpush.msra.mxu0 %v210_v49  ;;  %188 = vst [vmem:[#allocation1] ss:$2 sm:$0xff] %v167_v48  ;;  %v175_v3 = vsel %vm174_vm0, %v170_v1, 0.0  ;;  %v176_v4 = vsel %vm174_vm0, %v171_v2, 0.0  ;;  %v181_v32 = vmul.f32 256.0, %v441_v31  ;;  %vm185_vm1 = vweird.f32 %v441_v31 }
  0x25   : > { %343 = vmatpush.msra.mxu3 %v300_v47  ;;  %271 = vmatpush.msra.mxu1 %v226_v50  ;;  %v177_v5 = vadd.f32 %v176_v4, %v175_v3 }
  0x26   : > { %324 = vmatpush.msra.mxu2 %v283_v51  ;;  %252 = vmatpush.msra.mxu0 %v209_v53  ;;  %v182_v33 = vsub.f32 1.0, %v181_v32 }
  0x27   : > { %344 = vmatpush.msra.mxu3 %v299_v52  ;;  %272 = vmatpush.msra.mxu1 %v225_v54 }
  0x28   : > { %325 = vmatpush.msra.mxu2 %v282_v55  ;;  %253 = vmatpush.msra.mxu0 %v208_v57  ;;  %v183_v34 = vmul.f32 %v441_v31, %v182_v33 }
  0x29   : > { %345 = vmatpush.msra.mxu3 %v298_v56  ;;  %273 = vmatpush.msra.mxu1 %v224_v58 }
  0x2a   : > { %326 = vmatpush.msra.mxu2 %v281_v59  ;;  %254 = vmatpush.msra.mxu0 %v207_v61  ;;  %v184_v35 = vadd.f32 %v441_v31, %v183_v34 }
  0x2b   : > { %346 = vmatpush.msra.mxu3 %v297_v60  ;;  %274 = vmatpush.msra.mxu1 %v223_v62  ;;  %v189_v6 = vld.sshfl [vmem:[#allocation1] sm:$0xff pattern:$0x75316420]  ;;  %v190_v7 = vld.sshfl [vmem:[#allocation1 + $0x8] sm:$0xff pattern:$0x75316420] }
  0x2c   : > { %327 = vmatpush.msra.mxu2 %v280_v63  ;;  %178 = vadd.xlane.f32.xlu0 %v177_v5  ;;  %v193_v8 = vsel %vm174_vm0, %v189_v6, 0.0  ;;  %v200_v9 = vsel %vm174_vm0, %v190_v7, 0.0  ;;  %v186_v38 = vsel %vm185_vm1, %v441_v31, %v184_v35 }
  0x2d   : > { %347 = vmatpush.msra.mxu3 %v296_v0  ;;  %v194_v10 = vrot.slane %v193_v8, 4  ;;  %v201_v11 = vrot.slane %v200_v9, 4 }
  0x2f   : > { %v195_v12 = vadd.f32 %v194_v10, %v193_v8  ;;  %v202_v13 = vadd.f32 %v201_v11, %v200_v9 }
  0x31   : > { %v196_v14 = vrot.slane %v195_v12, 2  ;;  %v203_v15 = vrot.slane %v202_v13, 2 }
  0x33   : > { %v197_v16 = vadd.f32 %v196_v14, %v195_v12  ;;  %v204_v17 = vadd.f32 %v203_v15, %v202_v13 }
  0x35   : > { %v198_v18 = vrot.slane %v197_v16, 1  ;;  %v205_v19 = vrot.slane %v204_v17, 1 }
  0x37   : > { %v199_v20 = vadd.f32 %v198_v18, %v197_v16  ;;  %v206_v21 = vadd.f32 %v205_v19, %v204_v17 }
  0x39   : > { %255 = vmatmul.f32.vlgmr.msra.gmra.mxu0 %v199_v20  ;;  %275 = vmatmul.f32.vlgmr.msra.gmra.mxu1 %v206_v21 }
  0x3a   : > { %328 = vmatmul.f32.vlgmr.msra.gmra.mxu2 %v199_v20  ;;  %348 = vmatmul.f32.vlgmr.msra.gmra.mxu3 %v206_v21 }
  0x9f   : > { %v179_v36 = vpop.xlane.xlu0 %178 }
  0xa0   : > { %v187_v40 = vmul.f32 %v186_v38, %v179_v36 }
  0xa2   : > { %v356_v42 = vperm.slane %v187_v40, %v355_v39 }
  0xb6   : > { %v256_v22 = vpop.f32.mrf.mxu0  ;;  %v276_v23 = vpop.f32.mrf.mxu1 }
  0xb7   : > { %v277_v24 = vadd.f32 %v276_v23, %v256_v22 }
  0xb9   : > { %v279_v25 = vmul.f32 0.015625, %v277_v24 }
  0xbb   : > { %359 = vrot.lane.b32.xlu0 %v279_v25, %s450_s22 }
  0xbd   : > { %v329_v26 = vpop.f32.mrf.mxu2  ;;  %v349_v27 = vpop.f32.mrf.mxu3 }
  0xbe   : > { %v350_v28 = vadd.f32 %v349_v27, %v329_v26 }
  0xc0   : > { %v352_v29 = vmul.f32 0.015625, %v350_v28 }
  0xc2   : > { %363 = vrot.lane.b32.xlu1 %v352_v29, %s451_s23 }
 0x12d   : > { %v360_v41 = vpop.permute.xlu0 %359 }
 0x12e   : > { %v367_v43 = vsel %vm366_vm2, %v356_v42, %v360_v41 }
 0x134   : > { %v364_v44 = vpop.permute.xlu1 %363 }
 0x135   : > { %v369_v45 = vsel %vm368_vm3, %v367_v43, %v364_v44 }
 0x136   : > { %371 = vst.msk [vmem:[%s166_s26] sm:$0x1] %vm370_vm4, %v369_v45 }
 0x137 PF: > { %s13_s12 = sadd.s32 1, %s448_s12  }
 0x138   : > { %p10_p4 = scmp.ge.s32.totalorder %s13_s12, 4  }
 0x13a   :  { %12 = sbr.rel (!%p10_p4) target bundleno = 1 (0x1), region = 62 }

// kernel: cp_lowrank_forward.4
= control target key start
LH: loop header
LB: loop body
LE: loop exit
PB: predicated region body
PF: predicated region fallthrough
CT: control target
= control target key end

     0   :  { %13 = vsyncpa [#allocation3], 0  ;;  %s965_s27 = smov [#allocation2]   ;;  %s1365_s0 = inlined_call_operand.vmem [shape: f32[2,1,36], index: 0, kind: input, shape index: {}]   ;;  %s1366_s1 = inlined_call_operand.vmem [shape: f32[3,36,36], index: 1, kind: input, shape index: {}]   ;;  %s1367_s2 = inlined_call_operand.vmem [shape: f32[3,1,36], index: 2, kind: input, shape index: {}]   ;;  %s1368_s3 = inlined_call_operand.vmem [shape: f32[16,256], index: 3, kind: input, shape index: {}]   ;;  %s1369_s4 = inlined_call_operand.vmem [shape: f32[16,256], index: 4, kind: input, shape index: {}]   ;;  %s1370_s5 = inlined_call_operand.vmem [shape: f32[3], index: 5, kind: input, shape index: {}]   ;;  %s1371_s6 = inlined_call_operand.vmem [shape: f32[2,4,4], index: 6, kind: output, shape index: {0}]   ;;  %s1372_s7 = inlined_call_operand.vmem [shape: f32[2,4,256], index: 7, kind: output, shape index: {1}]  }
   0x1   :  { %s29_s26 = sshll.u32 %s1370_s5, 4  ;;  %s30_s26 = int_to_ptr.vmem [resolvable:$true] %s29_s26 }
   0x2   :  { %32 = dma.vmem_to_smem %s30_s26, 16, %s965_s27, [#allocation3]  }
   0x3   :  { %963 = dma.done.wait [#allocation3], 16  }
   0x4   :  { %964 = vsyncadd [#allocation3], 4294967280 }
   0x5   :  { %37 = sfence }
   0x6   :  { %v44_v0 = vld [vmem:[%s1366_s1 + $0x20] sm:$0xf]  ;;  %vm58_vm0 = vcmask 1043456   ;;  %v43_v1 = vld [vmem:[%s1366_s1 + $0x18] sm:$0xff]  ;;  %v42_v2 = vld [vmem:[%s1366_s1 + $0x10] sm:$0xff]  ;;  %vm55_vm1 = vcmask 293888   ;;  %v295_v45 = vlaneseq }
   0x7   :  { %884 = vmatpush.msk.msra.mxu0 %vm58_vm0, %v44_v0  ;;  %v1028_v3 = vld [vmem:[%s1365_s0] sm:$0x1]  ;;  %v1033_v4 = vld [vmem:[%s1365_s0 + $0x1] sm:$0x1]  ;;  %v41_v5 = vld [vmem:[%s1366_s1 + $0x8] sm:$0xff]  ;;  %s967_s27 = smov 108  }
   0x8   :  { %51 = vst [vmem:[#allocation1] ss:$9 sm:$0xff] %v1028_v3  ;;  %v40_v6 = vld [vmem:[%s1366_s1] sm:$0xff]  ;;  %v192_v12 = vld [vmem:[%s1368_s3 + $0x10] sm:$0xff]  ;;  %v1053_v13 = vld [vmem:[%s1368_s3 + $0x18] sm:$0xff]  ;;  %vm194_vm6 = vcmask 130048  }
   0x9   :  { %74 = vmatpush.msra.mxu0 %v43_v1  ;;  %53 = vst [vmem:[#allocation1 + $0x1] ss:$9 sm:$0xff] %v1033_v4  ;;  %v930_v8 = vld [vmem:[%s1367_s2] ss:$0 sm:$0xff]  ;;  %211 = vmatpush.msra.mxu1 %v192_v12  ;;  %v191_v16 = vld [vmem:[%s1368_s3 + $0x8] sm:$0xff]  ;;  %v1080_v29 = vld [vmem:[%s1369_s4 + $0x10] sm:$0xff] }
   0xa   :  { %v190_v14 = vld [vmem:[%s1368_s3] sm:$0xff]  ;;  %231 = vmatpush.msra.mxu2 %v1053_v13  ;;  %s966_s3 = smov 124   ;;  %v1085_v30 = vld [vmem:[%s1369_s4 + $0x18] sm:$0xff]  ;;  %257 = vmatpush.msra.mxu3 %v1080_v29  ;;  %v1097_v32 = vld [vmem:[%s1369_s4 + $0x8] sm:$0xff]  ;;  %vm103_vm7 = vcmask 123904   ;;  %v968_v41 = vmov 16.0  }
   0xb   :  { %75 = vmatpush.msra.mxu0 %v42_v2  ;;  %212 = vmatpush.msra.mxu1 %v190_v14  ;;  %v1090_v31 = vld [vmem:[%s1369_s4] sm:$0xff]  ;;  %vm1114_vm8 = vcmp.lt.s32.totalorder %v295_v45, 256  ;;  %v969_v48 = vmov 1.0   ;;  %v970_v50 = vmov 2.0   ;;  %vm140_vm10 = vcmask 25600   ;;  %s180_s18 = sld [smem:[#allocation2]] }
   0xc   :  { %232 = vmatpush.msra.mxu2 %v191_v16  ;;  %258 = vmatpush.msra.mxu3 %v1090_v31  ;;  %921 = vst.msk [vmem:[%s1372_s7 + $0x3] ss:$4 sm:$0x3] %vm1114_vm8, %v969_v48  ;;  %vm288_vm12 = vcmask 1040384   ;;  %vm290_vm13 = vcmask 1041409   ;;  %s899_s15 = sld [smem:[#allocation2 + $0x1]] }
   0xd   :  { %76 = vmatpush.msra.mxu0 %v41_v5  ;;  %277 = vmatpush.msrb.mxu1 %v1085_v30  ;;  %922 = vst.msk [vmem:[%s1372_s7 + $0xb] ss:$4 sm:$0x3] %vm1114_vm8, %v969_v48 }
   0xe   :  { %517 = vmatpush.msrb.mxu3 %v192_v12 }
   0xf   :  { %77 = vmatpush.msra.mxu0 %v40_v6  ;;  %278 = vmatpush.msrb.mxu1 %v1097_v32 }
  0x10   :  { %v54_v7 = vld [vmem:[#allocation1] sm:$0xff]  ;;  %518 = vmatpush.msrb.mxu3 %v190_v14 }
  0x11   :  { %885 = vmatmul.msk.f32.vlgmr.msra.gmra.mxu0 %vm55_vm1, %v54_v7 }
  0x12   :  { %537 = vmatpush.msrb.mxu0 %v1053_v13 }
  0x14   :  { %538 = vmatpush.msrb.mxu0 %v191_v16 }
  0x16   :  { %776 = vmatpush.msra.mxu0 %v192_v12 }
  0x18   :  { %777 = vmatpush.msra.mxu0 %v190_v14 }
  0x8e   :  { %v79_v9 = vpop.f32.mrf.mxu0 }
  0x8f   :  { %v80_v10 = vadd.f32 %v930_v8, %v79_v9 }
  0x91   :  { %v82_v11 = vand.u32 2147483647, %v80_v10 }
  0x93   :  { %v83_v15 = vadd.f32 1.0, %v82_v11 }
  0x95   :  { %933 = vrcp.f32 %v83_v15  ;;  %v95_v20 = vand.u32 2147483648, %v83_v15  ;;  %v93_v22 = vand.u32 2147483647, %v83_v15  ;;  %vm89_vm3 = vweird.f32 %v83_v15 }
  0x96   :  { %935 = vrcp.f32 %v968_v41 }
  0x97   :  { %v96_v24 = vor.u32 1.1754944e-38, %v95_v20  ;;  %vm94_vm5 = vcmp.eq.f32.partialorder %v93_v22, 8.507059e+37  ;;  %937 = vrcp.f32 %v970_v50  ;;  %v181_v50 = vstv %s180_s18 }
  0x9b   :  { %v934_v17 = vpop.eup %933 }
  0x9c   :  { %v85_v18 = vmul.f32 %v934_v17, %v83_v15  ;;  %vm90_vm2 = vweird.f32 %v934_v17  ;;  %v936_v42 = vpop.eup %935 }
  0x9d   :  { %vm91_vm4 = vmor %vm89_vm3, %vm90_vm2  ;;  %v108_v43 = vmul.f32 16.0, %v936_v42  ;;  %vm112_vm9 = vweird.f32 %v936_v42  ;;  %v938_v52 = vpop.eup %937  ;;  %vm187_vm3 = vcmask 24576  }
  0x9e   :  { %v86_v19 = vsub.f32 1.0, %v85_v18  ;;  %v149_v57 = vmul.f32 2.0, %v938_v52  ;;  %vm153_vm11 = vweird.f32 %v938_v52 }
  0x9f   :  { %v109_v44 = vsub.f32 1.0, %v108_v43 }
  0xa0   :  { %v87_v21 = vmul.f32 %v934_v17, %v86_v19  ;;  %v150_v0 = vsub.f32 1.0, %v149_v57 }
  0xa1   :  { %v110_v46 = vmul.f32 %v936_v42, %v109_v44 }
  0xa2   :  { %v88_v23 = vadd.f32 %v934_v17, %v87_v21  ;;  %v151_v8 = vmul.f32 %v938_v52, %v150_v0 }
  0xa3   :  { %v111_v51 = vadd.f32 %v936_v42, %v110_v46 }
  0xa4   :  { %v92_v25 = vsel %vm91_vm4, %v934_v17, %v88_v23  ;;  %v152_v17 = vadd.f32 %v938_v52, %v151_v8  ;;  %vm324_vm4 = vcmask 31744  }
  0xa5   :  { %v97_v26 = vsel %vm94_vm5, %v96_v24, %v92_v25  ;;  %v1128_v53 = vsel %vm112_vm9, %v936_v42, %v111_v51  ;;  %vm367_vm9 = vcmask 162816  }
  0xa6   :  { %v1063_v27 = vmul.f32 %v97_v26, %v80_v10  ;;  %v1144_v25 = vsel %vm153_vm11, %v938_v52, %v152_v17 }
  0xa8   :  { %100 = vrot.lane.b32.xlu0 %v1063_v27, %s966_s3  ;;  %v1069_v28 = vmul.f32 %v1063_v27, %v1063_v27 }
  0xaa   :  { %124 = vrot.lane.b32.xlu1 %v1069_v28, %s966_s3 }
  0xb0   :  { %115 = vrot.lane.b32.xlu0 %v1063_v27, %s967_s27 }
  0xb2   :  { %131 = vrot.lane.b32.xlu1 %v1069_v28, %s967_s27 }
 0x11a   :  { %v101_v33 = vpop.permute.xlu0 %100 }
 0x11b   :  { %886 = vmatmul.msk.f32.vlgmr.msra.gmra.mxu1 %vm194_vm6, %v101_v33  ;;  %887 = vmatmul.msk.f32.vlgmr.msra.gmra.mxu2 %vm194_vm6, %v101_v33  ;;  %v104_v34 = vsel %vm103_vm7, %v101_v33, 0.0 }
 0x11c   :  { %105 = vadd.xlane.f32.xlu2 %v104_v34  ;;  %v125_v35 = vpop.permute.xlu1 %124  ;;  %563 = vmatpush.msra.mxu1 %v1080_v29 }
 0x11d   :  { %v127_v36 = vsel %vm103_vm7, %v125_v35, 0.0 }
 0x11e   :  { %128 = vadd.xlane.f32.xlu0 %v127_v36  ;;  %564 = vmatpush.msra.mxu1 %v1090_v31 }
 0x122   :  { %v116_v37 = vpop.permute.xlu0 %115 }
 0x123   :  { %888 = vmatmul.msk.f32.vlgmr.msra.gmra.mxu3 %vm194_vm6, %v116_v37  ;;  %889 = vmatmul.msk.f32.vlgmr.msrb.gmra.mxu1 %vm194_vm6, %v116_v37  ;;  %v118_v38 = vsel %vm103_vm7, %v116_v37, 0.0 }
 0x124   :  { %119 = vadd.xlane.f32.xlu2 %v118_v38  ;;  %v132_v39 = vpop.permute.xlu1 %131  ;;  %583 = vmatpush.msra.mxu3 %v1085_v30 }
 0x125   :  { %v134_v40 = vsel %vm103_vm7, %v132_v39, 0.0  ;;  %796 = vmatpush.msrb.mxu1 %v1053_v13 }
 0x126   :  { %135 = vadd.xlane.f32.xlu1 %v134_v40  ;;  %584 = vmatpush.msra.mxu3 %v1097_v32 }
 0x127   :  { %797 = vmatpush.msrb.mxu1 %v191_v16 }
 0x18f   :  { %v106_v49 = vpop.xlane.xlu2 %105 }
 0x190   :  { %v1131_v56 = vmul.f32 %v1128_v53, %v106_v49 }
 0x191   :  { %v129_v54 = vpop.xlane.xlu0 %128 }
 0x192   :  { %v130_v61 = vmul.f32 %v129_v54, %v1128_v53 }
 0x197   :  { %v120_v55 = vpop.xlane.xlu2 %119 }
 0x198   :  { %v1134_v58 = vmul.f32 %v120_v55, %v1128_v53  ;;  %v214_v59 = vpop.f32.mrf.mxu1 }
 0x199   :  { %v136_v60 = vpop.xlane.xlu1 %135 }
 0x19a   :  { %v138_v62 = vmul.f32 %v1134_v58, %v1131_v56  ;;  %v137_v63 = vmul.f32 %v136_v60, %v1128_v53 }
 0x19c   :  { %v139_v1 = vmul.f32 %v138_v62, %v1063_v27  ;;  %v156_v2 = vmul.f32 %v137_v63, %v130_v61 }
 0x19e   :  { %v141_v5 = vsel %vm140_vm10, %v139_v1, 0.0  ;;  %v157_v6 = vmul.f32 %v156_v2, %v1069_v28  ;;  %v234_v13 = vpop.f32.mrf.mxu2 }
 0x19f   :  { %v142_v7 = vrot.slane %v141_v5, 4 }
 0x1a0   :  { %v158_v9 = vsel %vm140_vm10, %v157_v6, 0.0  ;;  %v280_v10 = vpop.f32.mrf.mxu1  ;;  %v971_v6 = vmov 4.0  }
 0x1a1   :  { %v143_v11 = vadd.f32 %v142_v7, %v141_v5  ;;  %v159_v12 = vrot.slane %v158_v9, 4  ;;  %v284_v16 = vmul.f32 %v280_v10, %v234_v13  ;;  %v894_v10 = vld [vmem:[%s1366_s1 + $0x40] sm:$0xff]  ;;  %v892_v13 = vld [vmem:[%s1366_s1 + $0x30] sm:$0xff] }
 0x1a3   :  { %v144_v14 = vrot.slane %v143_v11, 2  ;;  %v160_v15 = vadd.f32 %v159_v12, %v158_v9  ;;  %v287_v23 = vrot.slane %v284_v16, 7  ;;  %v895_v9 = vld [vmem:[%s1366_s1 + $0x48] sm:$0xf] }
 0x1a4   :  { %897 = vmatpush.msk.msrb.mxu2 %vm58_vm0, %v895_v9 }
 0x1a5   :  { %v145_v18 = vadd.f32 %v144_v14, %v143_v11  ;;  %v161_v19 = vrot.slane %v160_v15, 2  ;;  %v893_v11 = vld [vmem:[%s1366_s1 + $0x38] sm:$0xff]  ;;  %v891_v14 = vld [vmem:[%s1366_s1 + $0x28] sm:$0xff] }
 0x1a6   :  { %v260_v20 = vpop.f32.mrf.mxu3  ;;  %398 = vmatpush.msrb.mxu2 %v894_v10 }
 0x1a7   :  { %v146_v21 = vrot.slane %v145_v18, 1  ;;  %v162_v22 = vadd.f32 %v161_v19, %v160_v15  ;;  %v283_v24 = vmul.f32 %v260_v20, %v214_v59 }
 0x1a8   :  { %399 = vmatpush.msrb.mxu2 %v893_v11 }
 0x1a9   :  { %v147_v26 = vadd.f32 %v146_v21, %v145_v18  ;;  %v163_v28 = vrot.slane %v162_v22, 1  ;;  %v289_v33 = vsel %vm288_vm12, %v283_v24, %v287_v23  ;;  %v291_v34 = vsel %vm290_vm13, %v283_v24, %v287_v23 }
 0x1aa   :  { %v292_v35 = vrot.slane %v291_v34, 1  ;;  %299 = vst.msk [vmem:[%s1372_s7] ss:$4 sm:$0x3] %vm1114_vm8, %v289_v33  ;;  %400 = vmatpush.msrb.mxu2 %v892_v13 }
 0x1ab   :  { %v155_v36 = vmul.f32 %v1144_v25, %v147_v26  ;;  %v164_v37 = vadd.f32 %v163_v28, %v162_v22 }
 0x1ac   :  { %890 = vst.msk [vmem:[%s1372_s7 + $0x8] ss:$4 sm:$0x3] %vm1114_vm8, %v292_v35  ;;  %401 = vmatpush.msrb.mxu2 %v891_v14 }
 0x1ad   :  { %v166_v38 = vmul.f32 %v155_v36, %v155_v36  ;;  %v165_v39 = vmul.f32 %v164_v37, %v1144_v25  ;;  %v305_v51 = vsub.f32 %v139_v1, %v155_v36 }
 0x1af   :  { %v167_v40 = vsub.f32 %v165_v39, %v166_v38 }
 0x1b1   :  { %v168_v41 = vmax.f32 %v167_v40, 0.0 }
 0x1b3   :  { %v169_v42 = vadd.f32 1e-05, %v168_v41 }
 0x1b5   :  { %939 = vrsqrt.f32 %v169_v42  ;;  %vm176_vm15 = vweird.f32 %v169_v42 }
 0x1b6   :  { %941 = vrcp.f32 %v971_v6 }
 0x1bb   :  { %v940_v43 = vpop.eup %939 }
 0x1bc   :  { %v171_v44 = vmul.f32 %v940_v43, %v169_v42  ;;  %vm177_vm14 = vweird.f32 %v940_v43  ;;  %v942_v7 = vpop.eup %941  ;;  %v931_v42 = vld [vmem:[%s1367_s2 + $0x1] ss:$0 sm:$0xff] }
 0x1bd   :  { %vm178_vm2 = vmor %vm176_vm15, %vm177_vm14  ;;  %v317_v8 = vmul.f32 4.0, %v942_v7  ;;  %vm321_vm5 = vweird.f32 %v942_v7 }
 0x1be   :  { %v172_v45 = vmul.f32 %v940_v43, %v171_v44 }
 0x1bf   :  { %v318_v12 = vsub.f32 1.0, %v317_v8 }
 0x1c0   :  { %v173_v46 = vmul.f32 0.5, %v172_v45 }
 0x1c1   :  { %v319_v15 = vmul.f32 %v942_v7, %v318_v12 }
 0x1c2   :  { %v174_v48 = vsub.f32 1.5, %v173_v46 }
 0x1c3   :  { %v320_v16 = vadd.f32 %v942_v7, %v319_v15 }
 0x1c4   :  { %v175_v49 = vmul.f32 %v940_v43, %v174_v48 }
 0x1c5   :  { %v1192_v17 = vsel %vm321_vm5, %v942_v7, %v320_v16 }
 0x1c6   :  { %v179_v52 = vsel %vm178_vm2, %v940_v43, %v175_v49 }
 0x1c7   :  { %v312_v54 = vmul.f32 %v179_v52, %v1063_v27  ;;  %v306_v55 = vmul.f32 %v305_v51, %v179_v52  ;;  %v302_v57 = vmul.f32 %v179_v52, %v155_v36  ;;  %v182_v59 = vmul.f32 %v181_v50, %v179_v52 }
 0x1c9   :  { %v313_v60 = vsel %vm140_vm10, %v312_v54, 0.0  ;;  %v308_v61 = vrot.slane %v306_v55, 1  ;;  %v310_v62 = vsub.f32 %v1028_v3, %v306_v55  ;;  %v183_v63 = vmul.f32 %v182_v59, %v1063_v27 }
 0x1ca   :  { %314 = vadd.xlane.f32.xlu2 %v313_v60  ;;  %v1164_v0 = vmul.f32 %v302_v57, %v181_v50  ;;  %v325_v5 = vsel %vm324_vm4, %v302_v57, 0.0 }
 0x1cb   :  { %v311_v1 = vsub.f32 %v1033_v4, %v308_v61  ;;  %347 = vst [vmem:[#allocation1] ss:$9 sm:$0xff] %v310_v62  ;;  %v185_v2 = vrot.slane %v183_v63, 1 }
 0x1cc   :  { %188 = vst.msk [vmem:[%s1371_s6] sm:$0x1] %vm187_vm3, %v183_v63 }
 0x1cd   :  { %349 = vst [vmem:[#allocation1 + $0x1] ss:$9 sm:$0xff] %v311_v1 }
 0x1ce   :  { %189 = vst.msk [vmem:[%s1371_s6 + $0x4] sm:$0x1] %vm187_vm3, %v185_v2 }
 0x1d2   :  { %326 = vadd.xlane.f32.xlu2 %v325_v5 }
 0x1d4   :  { %v350_v35 = vld [vmem:[#allocation1] sm:$0xff] }
 0x23d   :  { %v315_v18 = vpop.xlane.xlu2 %314 }
 0x23e   :  { %v323_v19 = vmul.f32 %v1192_v17, %v315_v18 }
 0x240   :  { %v329_v20 = vmul.f32 %v323_v19, %v1134_v58  ;;  %v337_v24 = vmul.f32 %v323_v19, %v1131_v56 }
 0x242   :  { %v330_v22 = vmul.f32 %v329_v20, %v1063_v27  ;;  %v338_v34 = vmul.f32 %v337_v24, %v1063_v27 }
 0x245   :  { %v327_v21 = vpop.xlane.xlu2 %326 }
 0x246   :  { %v328_v23 = vmul.f32 %v327_v21, %v1192_v17 }
 0x248   :  { %v331_v26 = vsub.f32 %v330_v22, %v328_v23  ;;  %v339_v37 = vsub.f32 %v338_v34, %v328_v23 }
 0x24a   :  { %v333_v28 = vrot.slane %v331_v26, 1  ;;  %v335_v33 = vsub.f32 %v1028_v3, %v331_v26  ;;  %v341_v58 = vrot.slane %v339_v37, 1  ;;  %v343_v38 = vsub.f32 %v1028_v3, %v339_v37 }
 0x24c   :  { %v336_v36 = vsub.f32 %v1033_v4, %v333_v28  ;;  %354 = vst [vmem:[#allocation1] ss:$9 sm:$0xff] %v335_v33  ;;  %v344_v39 = vsub.f32 %v1033_v4, %v341_v58 }
 0x24e   :  { %356 = vst [vmem:[#allocation1 + $0x1] ss:$9 sm:$0xff] %v336_v36 }
 0x255   :  { %v357_v40 = vld [vmem:[#allocation1] sm:$0xff] }
 0x256   :  { %361 = vst [vmem:[#allocation1] ss:$9 sm:$0xff] %v343_v38  ;;  %v366_v41 = vsel %vm324_vm4, %v350_v35, %v357_v40 }
 0x257   :  { %363 = vst [vmem:[#allocation1 + $0x1] ss:$9 sm:$0xff] %v344_v39 }
 0x25e   :  { %v364_v56 = vld [vmem:[#allocation1] sm:$0xff] }
 0x25f   :  { %v1206_v27 = vsel %vm367_vm9, %v366_v41, %v364_v56 }
 0x260   :  { %898 = vmatmul.msk.f32.vlgmr.msrb.gmra.mxu2 %vm55_vm1, %v1206_v27 }
 0x2e3   :  { %v403_v3 = vpop.f32.mrf.mxu2 }
 0x2e4   :  { %v404_v43 = vadd.f32 %v931_v42, %v403_v3 }
 0x2e6   :  { %v406_v4 = vand.u32 2147483647, %v404_v43 }
 0x2e8   :  { %v407_v44 = vadd.f32 1.0, %v406_v4 }
 0x2ea   :  { %943 = vrcp.f32 %v407_v44  ;;  %v419_v49 = vand.u32 2147483648, %v407_v44  ;;  %v417_v51 = vand.u32 2147483647, %v407_v44  ;;  %vm413_vm14 = vweird.f32 %v407_v44 }
 0x2ec   :  { %v420_v54 = vor.u32 1.1754944e-38, %v419_v49  ;;  %vm418_vm2 = vcmp.eq.f32.partialorder %v417_v51, 8.507059e+37 }
 0x2f0   :  { %v944_v45 = vpop.eup %943 }
 0x2f1   :  { %v409_v46 = vmul.f32 %v944_v45, %v407_v44  ;;  %vm414_vm11 = vweird.f32 %v944_v45 }
 0x2f2   :  { %vm415_vm15 = vmor %vm413_vm14, %vm414_vm11 }
 0x2f3   :  { %v410_v48 = vsub.f32 1.0, %v409_v46 }
 0x2f5   :  { %v411_v50 = vmul.f32 %v944_v45, %v410_v48 }
 0x2f7   :  { %v412_v52 = vadd.f32 %v944_v45, %v411_v50 }
 0x2f9   :  { %v416_v55 = vsel %vm415_vm15, %v944_v45, %v412_v52 }
 0x2fa   :  { %v421_v57 = vsel %vm418_vm2, %v420_v54, %v416_v55 }
 0x2fb   :  { %v1213_v59 = vmul.f32 %v421_v57, %v404_v43 }
 0x2fd   :  { %424 = vrot.lane.b32.xlu2 %v1213_v59, %s966_s3  ;;  %v438_v60 = vmul.f32 %v1213_v59, %v1213_v59 }
 0x2ff   :  { %447 = vrot.lane.b32.xlu1 %v438_v60, %s967_s27  ;;  %440 = vrot.lane.b32.xlu0 %v438_v60, %s966_s3 }
 0x305   :  { %431 = vrot.lane.b32.xlu2 %v1213_v59, %s967_s27 }
 0x357   :  { %v425_v61 = vpop.permute.xlu2 %424 }
 0x358   :  { %900 = vmatmul.msk.f32.vlgmr.msrb.gmra.mxu3 %vm194_vm6, %v425_v61  ;;  %901 = vmatmul.msk.f32.vlgmr.msrb.gmra.mxu0 %vm194_vm6, %v425_v61  ;;  %v427_v62 = vsel %vm103_vm7, %v425_v61, 0.0 }
 0x359   :  { %428 = vadd.xlane.f32.xlu2 %v427_v62  ;;  %822 = vmatpush.msrb.mxu3 %v1080_v29 }
 0x35b   :  { %823 = vmatpush.msrb.mxu3 %v1090_v31 }
 0x35f   :  { %v432_v63 = vpop.permute.xlu2 %431 }
 0x360   :  { %902 = vmatmul.msk.f32.vlgmr.msra.gmra.mxu1 %vm194_vm6, %v432_v63  ;;  %903 = vmatmul.msk.f32.vlgmr.msra.gmra.mxu3 %vm194_vm6, %v432_v63  ;;  %v434_v1 = vsel %vm103_vm7, %v432_v63, 0.0  ;;  %v489_v63 = vstv %s899_s15 }
 0x361   :  { %435 = vadd.xlane.f32.xlu0 %v434_v1 }
 0x371   :  { %v448_v2 = vpop.permute.xlu1 %447  ;;  %v441_v5 = vpop.permute.xlu0 %440 }
 0x372   :  { %v450_v6 = vsel %vm103_vm7, %v448_v2, 0.0  ;;  %v443_v7 = vsel %vm103_vm7, %v441_v5, 0.0 }
 0x373   :  { %451 = vadd.xlane.f32.xlu2 %v450_v6  ;;  %444 = vadd.xlane.f32.xlu1 %v443_v7 }
 0x3cc   :  { %v429_v8 = vpop.xlane.xlu2 %428 }
 0x3cd   :  { %v1234_v31 = vmul.f32 %v429_v8, %v1128_v53 }
 0x3d4   :  { %v436_v29 = vpop.xlane.xlu0 %435 }
 0x3d5   :  { %v1237_v9 = vmul.f32 %v436_v29, %v1128_v53  ;;  %v540_v19 = vpop.f32.mrf.mxu0 }
 0x3d7   :  { %v454_v10 = vmul.f32 %v1237_v9, %v1234_v31 }
 0x3d9   :  { %v455_v11 = vmul.f32 %v454_v10, %v1213_v59 }
 0x3db   :  { %v456_v12 = vsel %vm140_vm10, %v455_v11, 0.0  ;;  %v520_v13 = vpop.f32.mrf.mxu3 }
 0x3dc   :  { %v457_v14 = vrot.slane %v456_v12, 4 }
 0x3dd   :  { %v566_v20 = vpop.f32.mrf.mxu1 }
 0x3de   :  { %v458_v15 = vadd.f32 %v457_v14, %v456_v12  ;;  %v589_v26 = vmul.f32 %v566_v20, %v520_v13  ;;  %v910_v14 = vld [vmem:[%s1366_s1 + $0x70] sm:$0xf] }
 0x3df   :  { %912 = vmatpush.msk.msra.mxu2 %vm58_vm0, %v910_v14 }
 0x3e0   :  { %v459_v16 = vrot.slane %v458_v15, 2 }
 0x3e2   :  { %v460_v18 = vadd.f32 %v459_v16, %v458_v15  ;;  %v909_v15 = vld [vmem:[%s1366_s1 + $0x68] sm:$0xff]  ;;  %v907_v16 = vld [vmem:[%s1366_s1 + $0x58] sm:$0xff] }
 0x3e3   :  { %v586_v21 = vpop.f32.mrf.mxu3  ;;  %657 = vmatpush.msra.mxu2 %v909_v15 }
 0x3e4   :  { %v461_v22 = vrot.slane %v460_v18, 1  ;;  %v590_v23 = vmul.f32 %v586_v21, %v540_v19 }
 0x3e6   :  { %v462_v24 = vadd.f32 %v461_v22, %v460_v18  ;;  %v593_v28 = vrot.slane %v590_v23, 7  ;;  %v452_v33 = vpop.xlane.xlu2 %451  ;;  %v445_v34 = vpop.xlane.xlu1 %444  ;;  %v906_v18 = vld [vmem:[%s1366_s1 + $0x50] sm:$0xff] }
 0x3e7   :  { %v453_v35 = vmul.f32 %v452_v33, %v1128_v53  ;;  %v446_v36 = vmul.f32 %v445_v34, %v1128_v53 }
 0x3e8   :  { %v463_v37 = vmul.f32 %v462_v24, %v1144_v25  ;;  %v594_v58 = vsel %vm288_vm12, %v589_v26, %v593_v28  ;;  %v595_v38 = vsel %vm290_vm13, %v589_v26, %v593_v28 }
 0x3e9   :  { %v596_v39 = vrot.slane %v595_v38, 1  ;;  %904 = vst.msk [vmem:[%s1372_s7 + $0x1] ss:$4 sm:$0x3] %vm1114_vm8, %v594_v58  ;;  %v464_v40 = vmul.f32 %v453_v35, %v446_v36 }
 0x3ea   :  { %v606_v56 = vsub.f32 %v455_v11, %v463_v37  ;;  %v474_v48 = vmul.f32 %v463_v37, %v463_v37 }
 0x3eb   :  { %905 = vst.msk [vmem:[%s1372_s7 + $0x9] ss:$4 sm:$0x3] %vm1114_vm8, %v596_v39  ;;  %v465_v41 = vmul.f32 %v464_v40, %v438_v60 }
 0x3ed   :  { %v466_v42 = vsel %vm140_vm10, %v465_v41, 0.0 }
 0x3ee   :  { %v467_v3 = vrot.slane %v466_v42, 4 }
 0x3f0   :  { %v468_v43 = vadd.f32 %v467_v3, %v466_v42 }
 0x3f2   :  { %v469_v4 = vrot.slane %v468_v43, 2 }
 0x3f4   :  { %v470_v44 = vadd.f32 %v469_v4, %v468_v43 }
 0x3f6   :  { %v471_v45 = vrot.slane %v470_v44, 1 }
 0x3f8   :  { %v472_v46 = vadd.f32 %v471_v45, %v470_v44 }
 0x3fa   :  { %v473_v49 = vmul.f32 %v472_v46, %v1144_v25 }
 0x3fc   :  { %v475_v50 = vsub.f32 %v473_v49, %v474_v48 }
 0x3fe   :  { %v476_v51 = vmax.f32 %v475_v50, 0.0 }
 0x400   :  { %v477_v52 = vadd.f32 1e-05, %v476_v51 }
 0x402   :  { %945 = vrsqrt.f32 %v477_v52  ;;  %vm484_vm11 = vweird.f32 %v477_v52 }
 0x408   :  { %v946_v54 = vpop.eup %945 }
 0x409   :  { %v479_v55 = vmul.f32 %v946_v54, %v477_v52  ;;  %vm485_vm5 = vweird.f32 %v946_v54 }
 0x40a   :  { %vm486_vm14 = vmor %vm484_vm11, %vm485_vm5 }
 0x40b   :  { %v480_v57 = vmul.f32 %v946_v54, %v479_v55 }
 0x40d   :  { %v481_v60 = vmul.f32 0.5, %v480_v57 }
 0x40f   :  { %v482_v61 = vsub.f32 1.5, %v481_v60 }
 0x411   :  { %v483_v62 = vmul.f32 %v946_v54, %v482_v61 }
 0x413   :  { %v487_v1 = vsel %vm486_vm14, %v946_v54, %v483_v62 }
 0x414   :  { %v609_v2 = vmul.f32 %v487_v1, %v1213_v59  ;;  %v607_v5 = vmul.f32 %v606_v56, %v487_v1  ;;  %v603_v6 = vmul.f32 %v487_v1, %v463_v37  ;;  %v490_v7 = vmul.f32 %v489_v63, %v487_v1 }
 0x416   :  { %v610_v8 = vsel %vm140_vm10, %v609_v2, 0.0  ;;  %v614_v29 = vsel %vm324_vm4, %v603_v6, 0.0  ;;  %v491_v10 = vmul.f32 %v490_v7, %v1213_v59  ;;  %v604_v11 = vmul.f32 %v603_v6, %v489_v63 }
 0x417   :  { %611 = vadd.xlane.f32.xlu2 %v610_v8  ;;  %615 = vadd.xlane.f32.xlu0 %v614_v29  ;;  %v608_v35 = vsub.f32 %v1206_v27, %v607_v5 }
 0x418   :  { %v493_v12 = vrot.slane %v491_v10, 1  ;;  %495 = vst.msk [vmem:[%s1371_s6 + $0x1] sm:$0x1] %vm187_vm3, %v491_v10  ;;  %v1269_v13 = vadd.f32 %v604_v11, %v1164_v0  ;;  %v908_v0 = vld [vmem:[%s1366_s1 + $0x60] sm:$0xff] }
 0x419   :  { %658 = vmatpush.msra.mxu2 %v908_v0 }
 0x41a   :  { %496 = vst.msk [vmem:[%s1371_s6 + $0x5] sm:$0x1] %vm187_vm3, %v493_v12 }
 0x41b   :  { %659 = vmatpush.msra.mxu2 %v907_v16 }
 0x41d   :  { %660 = vmatpush.msra.mxu2 %v906_v18 }
 0x41f   :  { %842 = vmatpush.msrb.mxu2 %v1085_v30 }
 0x421   :  { %843 = vmatpush.msrb.mxu2 %v1097_v32 }
 0x48a   :  { %v612_v19 = vpop.xlane.xlu2 %611  ;;  %v616_v21 = vpop.xlane.xlu0 %615 }
 0x48b   :  { %v613_v20 = vmul.f32 %v612_v19, %v1192_v17  ;;  %v617_v28 = vmul.f32 %v616_v21, %v1192_v17 }
 0x48d   :  { %v618_v22 = vmul.f32 %v613_v20, %v1237_v9  ;;  %v622_v23 = vmul.f32 %v613_v20, %v1234_v31 }
 0x48f   :  { %v619_v24 = vmul.f32 %v618_v22, %v1213_v59  ;;  %v623_v26 = vmul.f32 %v622_v23, %v1213_v59  ;;  %v932_v59 = vld [vmem:[%s1367_s2 + $0x2] ss:$0 sm:$0xff] }
 0x491   :  { %v620_v33 = vsub.f32 %v619_v24, %v617_v28  ;;  %v624_v34 = vsub.f32 %v623_v26, %v617_v28 }
 0x493   :  { %v621_v30 = vsub.f32 %v1206_v27, %v620_v33  ;;  %v625_v32 = vsub.f32 %v1206_v27, %v624_v34 }
 0x495   :  { %v626_v36 = vsel %vm324_vm4, %v608_v35, %v621_v30 }
 0x496   :  { %v627_v9 = vsel %vm367_vm9, %v626_v36, %v625_v32 }
 0x497   :  { %913 = vmatmul.msk.f32.vlgmr.msra.gmra.mxu2 %vm55_vm1, %v627_v9 }
 0x51a   :  { %v662_v31 = vpop.f32.mrf.mxu2 }
 0x51b   :  { %v663_v17 = vadd.f32 %v932_v59, %v662_v31 }
 0x51d   :  { %v665_v37 = vand.u32 2147483647, %v663_v17 }
 0x51f   :  { %v666_v58 = vadd.f32 1.0, %v665_v37 }
 0x521   :  { %947 = vrcp.f32 %v666_v58  ;;  %v678_v56 = vand.u32 2147483648, %v666_v58  ;;  %v676_v41 = vand.u32 2147483647, %v666_v58  ;;  %vm672_vm4 = vweird.f32 %v666_v58 }
 0x523   :  { %v679_v3 = vor.u32 1.1754944e-38, %v678_v56  ;;  %vm677_vm1 = vcmp.eq.f32.partialorder %v676_v41, 8.507059e+37 }
 0x527   :  { %v948_v38 = vpop.eup %947 }
 0x528   :  { %v668_v39 = vmul.f32 %v948_v38, %v666_v58  ;;  %vm673_vm0 = vweird.f32 %v948_v38 }
 0x529   :  { %vm674_vm9 = vmor %vm672_vm4, %vm673_vm0 }
 0x52a   :  { %v669_v40 = vsub.f32 1.0, %v668_v39 }
 0x52c   :  { %v670_v27 = vmul.f32 %v948_v38, %v669_v40 }
 0x52e   :  { %v671_v42 = vadd.f32 %v948_v38, %v670_v27 }
 0x530   :  { %v675_v43 = vsel %vm674_vm9, %v948_v38, %v671_v42 }
 0x531   :  { %v680_v4 = vsel %vm677_vm1, %v679_v3, %v675_v43 }
 0x532   :  { %v1308_v44 = vmul.f32 %v680_v4, %v663_v17 }
 0x534   :  { %683 = vrot.lane.b32.xlu1 %v1308_v44, %s966_s3  ;;  %690 = vrot.lane.b32.xlu2 %v1308_v44, %s967_s27  ;;  %v697_v45 = vmul.f32 %v1308_v44, %v1308_v44 }
 0x53c   :  { %706 = vrot.lane.b32.xlu1 %v697_v45, %s967_s27 }
 0x58e   :  { %v691_v46 = vpop.permute.xlu2 %690 }
 0x58f   :  { %917 = vmatmul.msk.f32.vlgmr.msrb.gmra.mxu3 %vm194_vm6, %v691_v46  ;;  %918 = vmatmul.msk.f32.vlgmr.msrb.gmra.mxu2 %vm194_vm6, %v691_v46  ;;  %v693_v51 = vsel %vm103_vm7, %v691_v46, 0.0 }
 0x5a6   :  { %v684_v48 = vpop.permute.xlu1 %683 }
 0x5a7   :  { %915 = vmatmul.msk.f32.vlgmr.msra.gmra.mxu0 %vm194_vm6, %v684_v48  ;;  %916 = vmatmul.msk.f32.vlgmr.msrb.gmra.mxu1 %vm194_vm6, %v684_v48  ;;  %v686_v49 = vsel %vm103_vm7, %v684_v48, 0.0 }
 0x5a8   :  { %687 = vadd.xlane.f32.xlu0 %v686_v49 }
 0x5ae   :  { %v707_v50 = vpop.permute.xlu1 %706 }
 0x5af   :  { %v709_v52 = vsel %vm103_vm7, %v707_v50, 0.0 }
 0x5b0   :  { %694 = vadd.xlane.f32.xlu0 %v693_v51  ;;  %710 = vadd.xlane.f32.xlu1 %v709_v52 }
 0x5c4   :  { %699 = vrot.lane.b32.xlu0 %v697_v45, %s966_s3 }
 0x612   :  { %v845_v55 = vpop.f32.mrf.mxu2  ;;  %v825_v2 = vpop.f32.mrf.mxu3 }
 0x61b   :  { %v688_v54 = vpop.xlane.xlu0 %687 }
 0x61c   :  { %v689_v60 = vmul.f32 %v688_v54, %v1128_v53 }
 0x623   :  { %v695_v57 = vpop.xlane.xlu0 %694  ;;  %v711_v18 = vpop.xlane.xlu1 %710 }
 0x624   :  { %v696_v61 = vmul.f32 %v695_v57, %v1128_v53  ;;  %v779_v62 = vpop.f32.mrf.mxu0  ;;  %v799_v63 = vpop.f32.mrf.mxu1  ;;  %v712_v21 = vmul.f32 %v711_v18, %v1128_v53 }
 0x625   :  { %v849_v1 = vmul.f32 %v845_v55, %v799_v63  ;;  %v848_v6 = vmul.f32 %v825_v2, %v779_v62 }
 0x626   :  { %v713_v5 = vmul.f32 %v696_v61, %v689_v60 }
 0x627   :  { %v852_v7 = vrot.slane %v849_v1, 7 }
 0x628   :  { %v714_v14 = vmul.f32 %v713_v5, %v1308_v44 }
 0x629   :  { %v853_v8 = vsel %vm288_vm12, %v848_v6, %v852_v7  ;;  %v854_v29 = vsel %vm290_vm13, %v848_v6, %v852_v7 }
 0x62a   :  { %v855_v10 = vrot.slane %v854_v29, 1  ;;  %919 = vst.msk [vmem:[%s1372_s7 + $0x2] ss:$4 sm:$0x3] %vm1114_vm8, %v853_v8  ;;  %v715_v15 = vsel %vm140_vm10, %v714_v14, 0.0 }
 0x62b   :  { %v716_v0 = vrot.slane %v715_v15, 4 }
 0x62c   :  { %920 = vst.msk [vmem:[%s1372_s7 + $0xa] ss:$4 sm:$0x3] %vm1114_vm8, %v855_v10  ;;  %s914_s7 = sld [smem:[#allocation2 + $0x2]] }
 0x62d   :  { %v717_v16 = vadd.f32 %v716_v0, %v715_v15 }
 0x62f   :  { %v718_v19 = vrot.slane %v717_v16, 2 }
 0x631   :  { %v719_v23 = vadd.f32 %v718_v19, %v717_v16 }
 0x632   :  { %v748_v41 = vstv %s914_s7 }
 0x633   :  { %v720_v28 = vrot.slane %v719_v23, 1 }
 0x635   :  { %v721_v30 = vadd.f32 %v720_v28, %v719_v23 }
 0x636   :  { %v700_v11 = vpop.permute.xlu0 %699 }
 0x637   :  { %v702_v12 = vsel %vm103_vm7, %v700_v11, 0.0  ;;  %v722_v36 = vmul.f32 %v721_v30, %v1144_v25 }
 0x638   :  { %703 = vadd.xlane.f32.xlu2 %v702_v12 }
 0x639   :  { %v733_v31 = vmul.f32 %v722_v36, %v722_v36 }
 0x6ab   :  { %v704_v20 = vpop.xlane.xlu2 %703 }
 0x6ac   :  { %v705_v47 = vmul.f32 %v704_v20, %v1128_v53 }
 0x6ae   :  { %v723_v22 = vmul.f32 %v712_v21, %v705_v47 }
 0x6b0   :  { %v724_v24 = vmul.f32 %v723_v22, %v697_v45 }
 0x6b2   :  { %v725_v26 = vsel %vm140_vm10, %v724_v24, 0.0 }
 0x6b3   :  { %v726_v33 = vrot.slane %v725_v26, 4 }
 0x6b5   :  { %v727_v34 = vadd.f32 %v726_v33, %v725_v26 }
 0x6b7   :  { %v728_v32 = vrot.slane %v727_v34, 2 }
 0x6b9   :  { %v729_v35 = vadd.f32 %v728_v32, %v727_v34 }
 0x6bb   :  { %v730_v9 = vrot.slane %v729_v35, 1 }
 0x6bd   :  { %v731_v59 = vadd.f32 %v730_v9, %v729_v35 }
 0x6bf   :  { %v732_v17 = vmul.f32 %v731_v59, %v1144_v25 }
 0x6c1   :  { %v734_v37 = vsub.f32 %v732_v17, %v733_v31 }
 0x6c3   :  { %v735_v53 = vmax.f32 %v734_v37, 0.0 }
 0x6c5   :  { %v736_v58 = vadd.f32 1e-05, %v735_v53 }
 0x6c7   :  { %949 = vrsqrt.f32 %v736_v58  ;;  %vm743_vm7 = vweird.f32 %v736_v58 }
 0x6cd   :  { %v950_v38 = vpop.eup %949 }
 0x6ce   :  { %v738_v39 = vmul.f32 %v950_v38, %v736_v58  ;;  %vm744_vm6 = vweird.f32 %v950_v38 }
 0x6cf   :  { %vm745_vm8 = vmor %vm743_vm7, %vm744_vm6 }
 0x6d0   :  { %v739_v40 = vmul.f32 %v950_v38, %v738_v39 }
 0x6d2   :  { %v740_v56 = vmul.f32 0.5, %v739_v40 }
 0x6d4   :  { %v741_v27 = vsub.f32 1.5, %v740_v56 }
 0x6d6   :  { %v742_v42 = vmul.f32 %v950_v38, %v741_v27 }
 0x6d8   :  { %v746_v3 = vsel %vm745_vm8, %v950_v38, %v742_v42 }
 0x6d9   :  { %v749_v43 = vmul.f32 %v748_v41, %v746_v3  ;;  %v862_v4 = vmul.f32 %v746_v3, %v722_v36 }
 0x6db   :  { %v750_v25 = vmul.f32 %v749_v43, %v1308_v44  ;;  %v863_v45 = vmul.f32 %v862_v4, %v748_v41 }
 0x6dd   :  { %v752_v46 = vrot.slane %v750_v25, 1  ;;  %754 = vst.msk [vmem:[%s1371_s6 + $0x2] sm:$0x1] %vm187_vm3, %v750_v25  ;;  %v864_v48 = vadd.f32 %v863_v45, %v1269_v13 }
 0x6df   :  { %755 = vst.msk [vmem:[%s1371_s6 + $0x6] sm:$0x1] %vm187_vm3, %v752_v46  ;;  %v865_v49 = vsub.f32 0.0, %v864_v48 }
 0x6e1   :  { %v867_v50 = vrot.slane %v865_v49, 1  ;;  %869 = vst.msk [vmem:[%s1371_s6 + $0x3] sm:$0x1] %vm187_vm3, %v865_v49 }
 0x6e3   :  { %870 = vst.msk [vmem:[%s1371_s6 + $0x7] sm:$0x1] %vm187_vm3, %v867_v50 }
 0x6e4   :  { %883 = vsyncpa [#allocation3], 1 }

// kernel: cp_lowrank_forward.5
= control target key start
LH: loop header
LB: loop body
LE: loop exit
PB: predicated region body
PF: predicated region fallthrough
CT: control target
= control target key end

     0   :  { %s532_s12 = smov 0   ;;  %s534_s13 = smov 0   ;;  %s571_s0 = inlined_call_operand.vmem [shape: f32[2,4,256], index: 0, kind: input, shape index: {}]   ;;  %s572_s1 = inlined_call_operand.vmem [shape: f32[2,4,4], index: 1, kind: input, shape index: {}]   ;;  %s573_s2 = inlined_call_operand.vmem [shape: f32[2,4,256], index: 2, kind: input, shape index: {}]   ;;  %s574_s3 = inlined_call_operand.vmem [shape: f32[2,4,256], index: 3, kind: output, shape index: {}]  }
   0x1   :  { %s536_s14 = smov 0  }
   0x2 LB: > { %s25_s15 = sadd.s32 1, %s506_s13  ;;  %p447_p0 = scmp.ge.s32.totalorder %s510_s14, 1  ;;  %s510_s14 = sphi %s536_s14, %s13_s14   ;;  %s506_s13 = sphi %s534_s13, %s576_s13   ;;  %s502_s12 = sphi %s532_s12, %s575_s12  }
   0x3   : > { %p27_p1 = scmp.ge.s32.totalorder %s25_s15, 2  ;;  %p184_p2 = scmp.lt.s32.totalorder %s510_s14, 3 }
   0x5   : > { %s578_s15 = smov (%p27_p1, %s25_s15), 0  ;;  %p185_p3 = pnand %p447_p0, %p184_p2 }
   0x6   : > { %p230_p4 = scmp.lt.s32.totalorder (!%p185_p3), %s502_s12, 1 }
   0x7   : > { %188 = sbr.rel (%p185_p3) target bundleno = 157 (0x9d), region = 32 }
   0xc   : > { %s580_s12 = smov (!%p230_p4, %s502_s12), 1  ;;  %vm273_vm0 = vcmask 1043456   ;;  %vm269_vm1 = vcmask 31744  }
   0xd   : > { %s461_s16 = sshll.u32 %s580_s12, 3  ;;  %s450_s20 = sshll.u32 %s580_s12, 2 }
   0xe   : > { %s251_s19 = scalar_lea.vmem %s573_s2, %s461_s16  ;;  %s242_s23 = scalar_lea.vmem %s572_s1, %s450_s20 }
   0xf   : > { %v264_v0 = vld [vmem:[%s251_s19] sm:$0xff]  ;;  %s237_s26 = scalar_lea.vmem %s571_s0, %s461_s16  ;;  %s261_s29 = scalar_lea.vmem %s574_s3, %s461_s16 }
  0x10   : > { %266 = vst [vmem:[#allocation1] ss:$2 sm:$0xff] %v264_v0  ;;  %v263_v1 = vld [vmem:[%s242_s23] sm:$0xf] }
  0x11   : > { %v318_v7 = vld [vmem:[%s237_s26] sm:$0xff] }
  0x17   : > { %v268_v2 = vld.sshfl [vmem:[#allocation1 + $0x8] sm:$0xff pattern:$0x75316420]  ;;  %v267_v3 = vld.sshfl [vmem:[#allocation1] sm:$0xff pattern:$0x75316420] }
  0x18   : > { %457 = vmatpush.msk.msra.mxu1 %vm273_vm0, %v268_v2  ;;  %455 = vmatpush.msk.msra.mxu0 %vm273_vm0, %v267_v3 }
  0x19   : > { %458 = vmatmul.msk.f32.vlgmr.msra.gmra.mxu1 %vm269_vm1, %v263_v1  ;;  %456 = vmatmul.msk.f32.vlgmr.msra.gmra.mxu0 %vm269_vm1, %v263_v1 }
  0x96   : > { %v315_v4 = vpop.f32.mrf.mxu1  ;;  %v295_v5 = vpop.f32.mrf.mxu0 }
  0x97   : > { %v321_v6 = vrot.slane %v315_v4, 4 }
  0x99   : > { %v322_v8 = vsel %vm273_vm0, %v295_v5, %v321_v6 }
  0x9a   : > { %v324_v9 = vadd.f32 %v322_v8, %v318_v7 }
  0x9c   : > { %325 = vst [vmem:[%s261_s29] sm:$0xff] %v324_v9 }
  0x9d PF: > { %s13_s14 = sadd.s32 1, %s510_s14   ;;  %s575_s12 = smov %s506_s13 }
  0x9e   : > { %p10_p5 = scmp.ge.s32.totalorder %s13_s14, 4   ;;  %s576_s13 = smov %s578_s15 }
  0xa0   :  { %12 = sbr.rel (!%p10_p5) target bundleno = 2 (0x2), region = 68 }

</bundles_post_ra>
